<compile_context>
chip_gen: v7x
topology: tpu7x:2x2x1
jax: 0.10.0
libtpu: 0.0.40
codegen_flags: <defaults>
</compile_context>

<pallas_src>
import jax
import jax.numpy as jnp
from jax.experimental import pallas as pl
from jax.experimental.pallas import tpu as pltpu

_BN_EPS = 1e-5


def _down_kernel(x_ref, w1_ref, s1_ref, b1_ref, w2_ref, s2_ref, b2_ref,
                 o_ref, pad1_ref, pad2_ref, pat_ref):
    # x_ref   : (NB, Hh, 2, Wh, 2*Cin) bf16 -- pool windows via free reshapes
    # w1_ref  : (9*Cin, Cmid)  bf16          -- dense im2col conv1 weights
    # w2_ref  : (9*Cmid, Cout) bf16
    # s*/b*   : (1, C) f32                   -- folded BatchNorm scale / bias
    # o_ref   : (NB, Cout, Hh*Wh) f32        -- NCHW-friendly output layout
    # pad1_ref: (NB, Hh+2, Wh+2, Cin)  bf16 scratch (zero halo)
    # pad2_ref: (NB, Hh+2, Wh+2, Cmid) bf16 scratch (zero halo)
    # pat_ref : (M, 9*max(Cin, Cmid)) bf16 scratch (dense im2col patches)
    NB, Hh, _, Wh, _ = x_ref.shape
    Cin = x_ref.shape[-1] // 2
    Cmid = w1_ref.shape[1]
    Cout = w2_ref.shape[1]
    M = NB * Hh * Wh

    # Per-step scratch re-init (only the 1-pixel halos actually need it, but a
    # full clear is a few KiB).  Every grid step is therefore independent, so
    # the batch axis can be "parallel" (v7x dual-TC sharding).
    pad1_ref[...] = jnp.zeros_like(pad1_ref)
    pad2_ref[...] = jnp.zeros_like(pad2_ref)

    # ---------------- MaxPool2d(2): pure elementwise max ----------------
    x = x_ref[...]                                        # (NB,Hh,2,Wh,2*Cin)
    rows = jnp.maximum(x[:, :, 0], x[:, :, 1])            # (NB,Hh,Wh,2*Cin)
    pooled = jnp.maximum(rows[..., :Cin], rows[..., Cin:])  # (NB,Hh,Wh,Cin)
    pad1_ref[:, 1:Hh + 1, 1:Wh + 1, :] = pooled

    # ---- Conv1 (3x3, pad=1): ONE dense im2col matmul + BN1 + ReLU ----
    for k in range(9):
        dy, dx = divmod(k, 3)
        slab = pad1_ref[:, dy:dy + Hh, dx:dx + Wh, :]      # (NB,Hh,Wh,Cin)
        pat_ref[:, k * Cin:(k + 1) * Cin] = slab.reshape(M, Cin)
    acc1 = jnp.dot(pat_ref[:, :9 * Cin], w1_ref[...],
                   preferred_element_type=jnp.float32)     # (M, Cmid) f32
    h = jnp.maximum(acc1 * s1_ref[...] + b1_ref[...], 0.0)

    # ---- Conv2 (3x3, pad=1): ONE dense im2col matmul + BN2 + ReLU ----
    pad2_ref[:, 1:Hh + 1, 1:Wh + 1, :] = (
        h.reshape(NB, Hh, Wh, Cmid).astype(pad2_ref.dtype))
    for k in range(9):
        dy, dx = divmod(k, 3)
        slab = pad2_ref[:, dy:dy + Hh, dx:dx + Wh, :]      # (NB,Hh,Wh,Cmid)
        pat_ref[:, k * Cmid:(k + 1) * Cmid] = slab.reshape(M, Cmid)
    acc2 = jnp.dot(pat_ref[:, :9 * Cmid], w2_ref[...],
                   preferred_element_type=jnp.float32)     # (M, Cout) f32
    out = jnp.maximum(acc2 * s2_ref[...] + b2_ref[...], 0.0)

    # Channel-major store: (NB, Hh*Wh, Cout) -> (NB, Cout, Hh*Wh) via an XLU
    # minor-dims transpose, so the wrapper gets NCHW with a free reshape and
    # the store lane width is Hh*Wh instead of Cout.
    y = out.reshape(NB, Hh * Wh, Cout)
    o_ref[...] = jnp.transpose(y, (0, 2, 1)).astype(o_ref.dtype)


def _fold_bn(gamma, beta, mean, var):
    s = gamma / jnp.sqrt(var + _BN_EPS)
    return s.astype(jnp.float32), (beta - mean * s).astype(jnp.float32)


def _prep_conv_w(w):
    # (O, I, 3, 3) -> (3, 3, I, O) -> dense im2col rows (9*I, O), bf16.
    o, i = w.shape[0], w.shape[1]
    return jnp.transpose(w, (2, 3, 1, 0)).reshape(9 * i, o).astype(jnp.bfloat16)


def _pick_block_n(n):
    # Largest per-step image count that still leaves >= 2 grid steps (so the
    # "parallel" batch axis can be split across v7x's two TensorCores); fall
    # back to the largest divisor of N otherwise.
    for nb in (8, 4, 2, 1):
        if n % nb == 0 and n // nb >= 2:
            return nb
    for nb in (8, 4, 2, 1):
        if n % nb == 0:
            return nb
    return 1


def _vmem_limit_bytes():
    # Per-generation scoped-VMEM limit: ~3/4 of physical capacity
    # (128 MiB on v5e/v6e -> 96 MiB, 64 MiB on v7x -> 48 MiB).
    cap = 64 * 1024 * 1024
    try:
        cap = int(getattr(pltpu.get_tpu_info(), "vmem_capacity_bytes", cap))
    except Exception:
        pass  # non-TPU / older runtime: keep the conservative default
    return max(32 * 1024 * 1024, min(cap * 3 // 4, 96 * 1024 * 1024))


def down_forward(x_nchw, params, block_n=None):
    """Down.forward — x_nchw: (N, Cin, H, W) -> (N, Cout, H//2, W//2)."""
    N, Cin, H, W = x_nchw.shape
    assert H % 2 == 0 and W % 2 == 0, "MaxPool2d(2) path assumes even H, W"
    Hh, Wh = H // 2, W // 2
    w1, w2 = params["w1"], params["w2"]
    Cmid, Cout = w1.shape[0], w2.shape[0]
    NB = _pick_block_n(N) if block_n is None else block_n
    assert N % NB == 0
    M = NB * Hh * Wh

    # Glue: NCHW -> NHWC (bf16: the MXU operands are bf16 anyway; note that
    # the pool then selects over bf16-rounded values), followed by *free*
    # reshapes exposing the 2x2 pool window -- no extra HBM relayout pass.
    x = jnp.transpose(x_nchw, (0, 2, 3, 1)).astype(jnp.bfloat16)
    x = x.reshape(N, Hh, 2, Wh, 2 * Cin)

    # Dense im2col weights (bf16) + folded eval-mode BatchNorm (f32).
    w1p, w2p = _prep_conv_w(w1), _prep_conv_w(w2)
    s1, b1 = _fold_bn(params["g1"], params["be1"], params["rm1"], params["rv1"])
    s2, b2 = _fold_bn(params["g2"], params["be2"], params["rm2"], params["rv2"])

    grid_spec = pltpu.PrefetchScalarGridSpec(
        num_scalar_prefetch=0,
        grid=(N // NB,),
        in_specs=[
            pl.BlockSpec((NB, Hh, 2, Wh, 2 * Cin), lambda b: (b, 0, 0, 0, 0)),
            # Grid-invariant operands (weights / BN scale / BN bias).
            pl.BlockSpec((9 * Cin, Cmid), lambda b: (0, 0)),
            pl.BlockSpec((1, Cmid), lambda b: (0, 0)),
            pl.BlockSpec((1, Cmid), lambda b: (0, 0)),
            pl.BlockSpec((9 * Cmid, Cout), lambda b: (0, 0)),
            pl.BlockSpec((1, Cout), lambda b: (0, 0)),
            pl.BlockSpec((1, Cout), lambda b: (0, 0)),
        ],
        out_specs=pl.BlockSpec((NB, Cout, Hh * Wh), lambda b: (b, 0, 0)),
        scratch_shapes=[
            pltpu.VMEM((NB, Hh + 2, Wh + 2, Cin), jnp.bfloat16),
            pltpu.VMEM((NB, Hh + 2, Wh + 2, Cmid), jnp.bfloat16),
            pltpu.VMEM((M, 9 * max(Cin, Cmid)), jnp.bfloat16),
        ],
    )

    out = pl.pallas_call(
        _down_kernel,
        out_shape=jax.ShapeDtypeStruct((N, Cout, Hh * Wh), jnp.float32),
        grid_spec=grid_spec,
        compiler_params=pltpu.CompilerParams(
            dimension_semantics=("parallel",),
            vmem_limit_bytes=_vmem_limit_bytes()),
    )(x, w1p, s1.reshape(1, Cmid), b1.reshape(1, Cmid),
      w2p, s2.reshape(1, Cout), b2.reshape(1, Cout))

    # Already channel-major: NCHW needs only a free reshape, no transpose.
    return out.reshape(N, Cout, Hh, Wh)


def down_ref(x, params):
    """Pure-JAX f32 reference (eval-mode BN), NCHW in / NCHW out."""
    N, C, H, W = x.shape
    xp = x.reshape(N, C, H // 2, 2, W // 2, 2).max(axis=(3, 5))

    def conv_bn_relu(y, w, g, be, rm, rv):
        out = jax.lax.conv_general_dilated(
            y, w, window_strides=(1, 1), padding=((1, 1), (1, 1)),
            dimension_numbers=("NCHW", "OIHW", "NCHW"))
        s = g / jnp.sqrt(rv + _BN_EPS)
        out = out * s[None, :, None, None] + (be - rm * s)[None, :, None, None]
        return jnp.maximum(out, 0.0)

    h = conv_bn_relu(xp, params["w1"], params["g1"], params["be1"],
                     params["rm1"], params["rv1"])
    return conv_bn_relu(h, params["w2"], params["g2"], params["be2"],
                        params["rm2"], params["rv2"])


if __name__ == "__main__":
    key = jax.random.PRNGKey(0)
    N, Cin, H, W = 2, 4, 16, 16
    Cout = 8   # Down(in_dim=4, out_dim=8); DoubleConv mid_dim defaults to out_dim
    ks = jax.random.split(key, 11)

    x = jax.random.normal(ks[0], (N, Cin, H, W), jnp.float32)
    params = dict(
        w1=jax.random.normal(ks[1], (Cout, Cin, 3, 3), jnp.float32) * 0.1,
        g1=jax.random.uniform(ks[2], (Cout,), jnp.float32, 0.5, 1.5),
        be1=jax.random.normal(ks[3], (Cout,), jnp.float32) * 0.1,
        rm1=jax.random.normal(ks[4], (Cout,), jnp.float32) * 0.1,
        rv1=jax.random.uniform(ks[5], (Cout,), jnp.float32, 0.5, 1.5),
        w2=jax.random.normal(ks[6], (Cout, Cout, 3, 3), jnp.float32) * 0.1,
        g2=jax.random.uniform(ks[7], (Cout,), jnp.float32, 0.5, 1.5),
        be2=jax.random.normal(ks[8], (Cout,), jnp.float32) * 0.1,
        rm2=jax.random.normal(ks[9], (Cout,), jnp.float32) * 0.1,
        rv2=jax.random.uniform(ks[10], (Cout,), jnp.float32, 0.5, 1.5),
    )

    out = jax.jit(down_forward)(x, params)
    out = jax.block_until_ready(out)
    assert out.shape == (N, Cout, H // 2, W // 2), out.shape

    ref = down_ref(x, params)
    # bf16 MXU operands / bf16 pooling with f32 accumulation -> elementwise
    # tolerance check (tighter than rev 2's loose aggregate allclose).
    abs_err = jnp.abs(out - ref)
    if not bool(jnp.all(abs_err <= 2e-2 + 2e-2 * jnp.abs(ref))):
        raise AssertionError(
            "Pallas kernel mismatch: max abs err = "
            f"{float(jnp.max(abs_err)):.3e}")
    print("KERNEL_OK")
</pallas_src>

<mosaic_0001>
module attributes {stable_mosaic.version = 11 : i64} {
  func.func @_down_kernel(%arg0: i32, %arg1: memref<1x8x2x8x8xbf16, #tpu.memory_space<vmem>>, %arg2: memref<36x8xbf16, #tpu.memory_space<vmem>>, %arg3: memref<1x8xf32, #tpu.memory_space<vmem>>, %arg4: memref<1x8xf32, #tpu.memory_space<vmem>>, %arg5: memref<72x8xbf16, #tpu.memory_space<vmem>>, %arg6: memref<1x8xf32, #tpu.memory_space<vmem>>, %arg7: memref<1x8xf32, #tpu.memory_space<vmem>>, %arg8: memref<1x8x64xf32, #tpu.memory_space<vmem>>, %arg9: memref<1x10x10x4xbf16, #tpu.memory_space<vmem>>, %arg10: memref<1x10x10x8xbf16, #tpu.memory_space<vmem>>, %arg11: memref<64x72xbf16, #tpu.memory_space<vmem>>) attributes {dimension_semantics = [#tpu.dimension_semantics<parallel>], iteration_bounds = array<i64: 2>, scalar_prefetch = 0 : i64, scratch_operands = 3 : i64, tpu.core_type = #tpu.core_type<tc>, window_params = [{transform_indices = @transform_0, window_bounds = array<i64: 1, 8, 2, 8, 8>}, {pipeline_mode = #tpu.pipeline_mode<synchronous>, transform_indices = @transform_1, window_bounds = array<i64: 36, 8>}, {pipeline_mode = #tpu.pipeline_mode<synchronous>, transform_indices = @transform_2, window_bounds = array<i64: 1, 8>}, {pipeline_mode = #tpu.pipeline_mode<synchronous>, transform_indices = @transform_3, window_bounds = array<i64: 1, 8>}, {pipeline_mode = #tpu.pipeline_mode<synchronous>, transform_indices = @transform_4, window_bounds = array<i64: 72, 8>}, {pipeline_mode = #tpu.pipeline_mode<synchronous>, transform_indices = @transform_5, window_bounds = array<i64: 1, 8>}, {pipeline_mode = #tpu.pipeline_mode<synchronous>, transform_indices = @transform_6, window_bounds = array<i64: 1, 8>}, {transform_indices = @transform_7, window_bounds = array<i64: 1, 8, 64>}]} {
    %cst = arith.constant 0.000000e+00 : bf16
    %0 = vector.broadcast %cst : bf16 to vector<1x10x10x4xbf16>
    %c0 = arith.constant 0 : index
    %c0_0 = arith.constant 0 : index
    %c0_1 = arith.constant 0 : index
    %c0_2 = arith.constant 0 : index
    %1 = vector.load %arg9[%c0, %c0_0, %c0_1, %c0_2] : memref<1x10x10x4xbf16, #tpu.memory_space<vmem>>, vector<1x10x10x4xbf16>
    tpu.vector_store %arg9[%c0, %c0_0, %c0_1, %c0_2], %0 {strides = array<i32>} : memref<1x10x10x4xbf16, #tpu.memory_space<vmem>>, vector<1x10x10x4xbf16>,
    %cst_3 = arith.constant 0.000000e+00 : bf16
    %2 = vector.broadcast %cst_3 : bf16 to vector<1x10x10x8xbf16>
    %c0_4 = arith.constant 0 : index
    %c0_5 = arith.constant 0 : index
    %c0_6 = arith.constant 0 : index
    %c0_7 = arith.constant 0 : index
    %3 = vector.load %arg10[%c0_4, %c0_5, %c0_6, %c0_7] : memref<1x10x10x8xbf16, #tpu.memory_space<vmem>>, vector<1x10x10x8xbf16>
    tpu.vector_store %arg10[%c0_4, %c0_5, %c0_6, %c0_7], %2 {strides = array<i32>} : memref<1x10x10x8xbf16, #tpu.memory_space<vmem>>, vector<1x10x10x8xbf16>,
    %c0_8 = arith.constant 0 : index
    %c0_9 = arith.constant 0 : index
    %c0_10 = arith.constant 0 : index
    %c0_11 = arith.constant 0 : index
    %c0_12 = arith.constant 0 : index
    %4 = vector.load %arg1[%c0_8, %c0_9, %c0_10, %c0_11, %c0_12] : memref<1x8x2x8x8xbf16, #tpu.memory_space<vmem>>, vector<1x8x2x8x8xbf16>
    %5 = vector.extract_strided_slice %4 {offsets = [0, 0, 0, 0, 0], sizes = [1, 8, 1, 8, 8], strides = [1, 1, 1, 1, 1]} : vector<1x8x2x8x8xbf16> to vector<1x8x1x8x8xbf16>
    %6 = vector.shape_cast %5 : vector<1x8x1x8x8xbf16> to vector<1x8x8x8xbf16>
    %7 = vector.extract_strided_slice %4 {offsets = [0, 0, 1, 0, 0], sizes = [1, 8, 1, 8, 8], strides = [1, 1, 1, 1, 1]} : vector<1x8x2x8x8xbf16> to vector<1x8x1x8x8xbf16>
    %8 = vector.shape_cast %7 : vector<1x8x1x8x8xbf16> to vector<1x8x8x8xbf16>
    %9 = arith.maximumf %6, %8 : vector<1x8x8x8xbf16>
    %10 = vector.extract_strided_slice %9 {offsets = [0, 0, 0, 0], sizes = [1, 8, 8, 4], strides = [1, 1, 1, 1]} : vector<1x8x8x8xbf16> to vector<1x8x8x4xbf16>
    %11 = vector.extract_strided_slice %9 {offsets = [0, 0, 0, 4], sizes = [1, 8, 8, 4], strides = [1, 1, 1, 1]} : vector<1x8x8x8xbf16> to vector<1x8x8x4xbf16>
    %12 = arith.maximumf %10, %11 : vector<1x8x8x4xbf16>
    %c0_13 = arith.constant 0 : index
    %c1 = arith.constant 1 : index
    %c1_14 = arith.constant 1 : index
    %c0_15 = arith.constant 0 : index
    %13 = vector.load %arg9[%c0_13, %c1, %c1_14, %c0_15] : memref<1x10x10x4xbf16, #tpu.memory_space<vmem>>, vector<1x8x8x4xbf16>
    tpu.vector_store %arg9[%c0_13, %c1, %c1_14, %c0_15], %12 {strides = array<i32>} : memref<1x10x10x4xbf16, #tpu.memory_space<vmem>>, vector<1x8x8x4xbf16>,
    %c0_16 = arith.constant 0 : index
    %c0_17 = arith.constant 0 : index
    %c0_18 = arith.constant 0 : index
    %c0_19 = arith.constant 0 : index
    %14 = vector.load %arg9[%c0_16, %c0_17, %c0_18, %c0_19] : memref<1x10x10x4xbf16, #tpu.memory_space<vmem>>, vector<1x8x8x4xbf16>
    %15 = vector.shape_cast %14 : vector<1x8x8x4xbf16> to vector<64x4xbf16>
    %c0_20 = arith.constant 0 : index
    %c0_21 = arith.constant 0 : index
    %16 = vector.load %arg11[%c0_20, %c0_21] : memref<64x72xbf16, #tpu.memory_space<vmem>>, vector<64x4xbf16>
    tpu.vector_store %arg11[%c0_20, %c0_21], %15 {strides = array<i32>} : memref<64x72xbf16, #tpu.memory_space<vmem>>, vector<64x4xbf16>,
    %c0_22 = arith.constant 0 : index
    %c0_23 = arith.constant 0 : index
    %c1_24 = arith.constant 1 : index
    %c0_25 = arith.constant 0 : index
    %17 = vector.load %arg9[%c0_22, %c0_23, %c1_24, %c0_25] : memref<1x10x10x4xbf16, #tpu.memory_space<vmem>>, vector<1x8x8x4xbf16>
    %18 = vector.shape_cast %17 : vector<1x8x8x4xbf16> to vector<64x4xbf16>
    %c0_26 = arith.constant 0 : index
    %c4 = arith.constant 4 : index
    %19 = vector.load %arg11[%c0_26, %c4] : memref<64x72xbf16, #tpu.memory_space<vmem>>, vector<64x4xbf16>
    tpu.vector_store %arg11[%c0_26, %c4], %18 {strides = array<i32>} : memref<64x72xbf16, #tpu.memory_space<vmem>>, vector<64x4xbf16>,
    %c0_27 = arith.constant 0 : index
    %c0_28 = arith.constant 0 : index
    %c2 = arith.constant 2 : index
    %c0_29 = arith.constant 0 : index
    %20 = vector.load %arg9[%c0_27, %c0_28, %c2, %c0_29] : memref<1x10x10x4xbf16, #tpu.memory_space<vmem>>, vector<1x8x8x4xbf16>
    %21 = vector.shape_cast %20 : vector<1x8x8x4xbf16> to vector<64x4xbf16>
    %c0_30 = arith.constant 0 : index
    %c8 = arith.constant 8 : index
    %22 = vector.load %arg11[%c0_30, %c8] : memref<64x72xbf16, #tpu.memory_space<vmem>>, vector<64x4xbf16>
    tpu.vector_store %arg11[%c0_30, %c8], %21 {strides = array<i32>} : memref<64x72xbf16, #tpu.memory_space<vmem>>, vector<64x4xbf16>,
    %c0_31 = arith.constant 0 : index
    %c1_32 = arith.constant 1 : index
    %c0_33 = arith.constant 0 : index
    %c0_34 = arith.constant 0 : index
    %23 = vector.load %arg9[%c0_31, %c1_32, %c0_33, %c0_34] : memref<1x10x10x4xbf16, #tpu.memory_space<vmem>>, vector<1x8x8x4xbf16>
    %24 = vector.shape_cast %23 : vector<1x8x8x4xbf16> to vector<64x4xbf16>
    %c0_35 = arith.constant 0 : index
    %c12 = arith.constant 12 : index
    %25 = vector.load %arg11[%c0_35, %c12] : memref<64x72xbf16, #tpu.memory_space<vmem>>, vector<64x4xbf16>
    tpu.vector_store %arg11[%c0_35, %c12], %24 {strides = array<i32>} : memref<64x72xbf16, #tpu.memory_space<vmem>>, vector<64x4xbf16>,
    %c0_36 = arith.constant 0 : index
    %c1_37 = arith.constant 1 : index
    %c1_38 = arith.constant 1 : index
    %c0_39 = arith.constant 0 : index
    %26 = vector.load %arg9[%c0_36, %c1_37, %c1_38, %c0_39] : memref<1x10x10x4xbf16, #tpu.memory_space<vmem>>, vector<1x8x8x4xbf16>
    %27 = vector.shape_cast %26 : vector<1x8x8x4xbf16> to vector<64x4xbf16>
    %c0_40 = arith.constant 0 : index
    %c16 = arith.constant 16 : index
    %28 = vector.load %arg11[%c0_40, %c16] : memref<64x72xbf16, #tpu.memory_space<vmem>>, vector<64x4xbf16>
    tpu.vector_store %arg11[%c0_40, %c16], %27 {strides = array<i32>} : memref<64x72xbf16, #tpu.memory_space<vmem>>, vector<64x4xbf16>,
    %c0_41 = arith.constant 0 : index
    %c1_42 = arith.constant 1 : index
    %c2_43 = arith.constant 2 : index
    %c0_44 = arith.constant 0 : index
    %29 = vector.load %arg9[%c0_41, %c1_42, %c2_43, %c0_44] : memref<1x10x10x4xbf16, #tpu.memory_space<vmem>>, vector<1x8x8x4xbf16>
    %30 = vector.shape_cast %29 : vector<1x8x8x4xbf16> to vector<64x4xbf16>
    %c0_45 = arith.constant 0 : index
    %c20 = arith.constant 20 : index
    %31 = vector.load %arg11[%c0_45, %c20] : memref<64x72xbf16, #tpu.memory_space<vmem>>, vector<64x4xbf16>
    tpu.vector_store %arg11[%c0_45, %c20], %30 {strides = array<i32>} : memref<64x72xbf16, #tpu.memory_space<vmem>>, vector<64x4xbf16>,
    %c0_46 = arith.constant 0 : index
    %c2_47 = arith.constant 2 : index
    %c0_48 = arith.constant 0 : index
    %c0_49 = arith.constant 0 : index
    %32 = vector.load %arg9[%c0_46, %c2_47, %c0_48, %c0_49] : memref<1x10x10x4xbf16, #tpu.memory_space<vmem>>, vector<1x8x8x4xbf16>
    %33 = vector.shape_cast %32 : vector<1x8x8x4xbf16> to vector<64x4xbf16>
    %c0_50 = arith.constant 0 : index
    %c24 = arith.constant 24 : index
    %34 = vector.load %arg11[%c0_50, %c24] : memref<64x72xbf16, #tpu.memory_space<vmem>>, vector<64x4xbf16>
    tpu.vector_store %arg11[%c0_50, %c24], %33 {strides = array<i32>} : memref<64x72xbf16, #tpu.memory_space<vmem>>, vector<64x4xbf16>,
    %c0_51 = arith.constant 0 : index
    %c2_52 = arith.constant 2 : index
    %c1_53 = arith.constant 1 : index
    %c0_54 = arith.constant 0 : index
    %35 = vector.load %arg9[%c0_51, %c2_52, %c1_53, %c0_54] : memref<1x10x10x4xbf16, #tpu.memory_space<vmem>>, vector<1x8x8x4xbf16>
    %36 = vector.shape_cast %35 : vector<1x8x8x4xbf16> to vector<64x4xbf16>
    %c0_55 = arith.constant 0 : index
    %c28 = arith.constant 28 : index
    %37 = vector.load %arg11[%c0_55, %c28] : memref<64x72xbf16, #tpu.memory_space<vmem>>, vector<64x4xbf16>
    tpu.vector_store %arg11[%c0_55, %c28], %36 {strides = array<i32>} : memref<64x72xbf16, #tpu.memory_space<vmem>>, vector<64x4xbf16>,
    %c0_56 = arith.constant 0 : index
    %c2_57 = arith.constant 2 : index
    %c2_58 = arith.constant 2 : index
    %c0_59 = arith.constant 0 : index
    %38 = vector.load %arg9[%c0_56, %c2_57, %c2_58, %c0_59] : memref<1x10x10x4xbf16, #tpu.memory_space<vmem>>, vector<1x8x8x4xbf16>
    %39 = vector.shape_cast %38 : vector<1x8x8x4xbf16> to vector<64x4xbf16>
    %c0_60 = arith.constant 0 : index
    %c32 = arith.constant 32 : index
    %40 = vector.load %arg11[%c0_60, %c32] : memref<64x72xbf16, #tpu.memory_space<vmem>>, vector<64x4xbf16>
    tpu.vector_store %arg11[%c0_60, %c32], %39 {strides = array<i32>} : memref<64x72xbf16, #tpu.memory_space<vmem>>, vector<64x4xbf16>,
    %c0_61 = arith.constant 0 : index
    %c0_62 = arith.constant 0 : index
    %41 = vector.load %arg11[%c0_61, %c0_62] : memref<64x72xbf16, #tpu.memory_space<vmem>>, vector<64x36xbf16>
    %c0_63 = arith.constant 0 : index
    %c0_64 = arith.constant 0 : index
    %42 = vector.load %arg2[%c0_63, %c0_64] : memref<36x8xbf16, #tpu.memory_space<vmem>>, vector<36x8xbf16>
    %cst_65 = arith.constant dense<0.000000e+00> : vector<64x8xf32>
    %43 = tpu.matmul %41, %42, %cst_65 {dimension_numbers = #tpu.dot_dimension_numbers<[1], [0], [0], [1], [0, 0, 1, 1], [], []>} : vector<64x36xbf16>, vector<36x8xbf16>, vector<64x8xf32> -> vector<64x8xf32>
    %c0_66 = arith.constant 0 : index
    %c0_67 = arith.constant 0 : index
    %44 = vector.load %arg3[%c0_66, %c0_67] : memref<1x8xf32, #tpu.memory_space<vmem>>, vector<1x8xf32>
    %45 = vector.broadcast %44 : vector<1x8xf32> to vector<64x8xf32>
    %46 = arith.mulf %43, %45 : vector<64x8xf32>
    %c0_68 = arith.constant 0 : index
    %c0_69 = arith.constant 0 : index
    %47 = vector.load %arg4[%c0_68, %c0_69] : memref<1x8xf32, #tpu.memory_space<vmem>>, vector<1x8xf32>
    %48 = vector.broadcast %47 : vector<1x8xf32> to vector<64x8xf32>
    %49 = arith.addf %46, %48 : vector<64x8xf32>
    %cst_70 = arith.constant 0.000000e+00 : f32
    %50 = vector.broadcast %cst_70 : f32 to vector<64x8xf32>
    %51 = arith.maximumf %49, %50 : vector<64x8xf32>
    %52 = vector.shape_cast %51 : vector<64x8xf32> to vector<1x8x8x8xf32>
    %53 = arith.truncf %52 : vector<1x8x8x8xf32> to vector<1x8x8x8xbf16>
    %c0_71 = arith.constant 0 : index
    %c1_72 = arith.constant 1 : index
    %c1_73 = arith.constant 1 : index
    %c0_74 = arith.constant 0 : index
    %54 = vector.load %arg10[%c0_71, %c1_72, %c1_73, %c0_74] : memref<1x10x10x8xbf16, #tpu.memory_space<vmem>>, vector<1x8x8x8xbf16>
    tpu.vector_store %arg10[%c0_71, %c1_72, %c1_73, %c0_74], %53 {strides = array<i32>} : memref<1x10x10x8xbf16, #tpu.memory_space<vmem>>, vector<1x8x8x8xbf16>,
    %c0_75 = arith.constant 0 : index
    %c0_76 = arith.constant 0 : index
    %c0_77 = arith.constant 0 : index
    %c0_78 = arith.constant 0 : index
    %55 = vector.load %arg10[%c0_75, %c0_76, %c0_77, %c0_78] : memref<1x10x10x8xbf16, #tpu.memory_space<vmem>>, vector<1x8x8x8xbf16>
    %56 = vector.shape_cast %55 : vector<1x8x8x8xbf16> to vector<64x8xbf16>
    %c0_79 = arith.constant 0 : index
    %c0_80 = arith.constant 0 : index
    %57 = vector.load %arg11[%c0_79, %c0_80] : memref<64x72xbf16, #tpu.memory_space<vmem>>, vector<64x8xbf16>
    tpu.vector_store %arg11[%c0_79, %c0_80], %56 {strides = array<i32>} : memref<64x72xbf16, #tpu.memory_space<vmem>>, vector<64x8xbf16>,
    %c0_81 = arith.constant 0 : index
    %c0_82 = arith.constant 0 : index
    %c1_83 = arith.constant 1 : index
    %c0_84 = arith.constant 0 : index
    %58 = vector.load %arg10[%c0_81, %c0_82, %c1_83, %c0_84] : memref<1x10x10x8xbf16, #tpu.memory_space<vmem>>, vector<1x8x8x8xbf16>
    %59 = vector.shape_cast %58 : vector<1x8x8x8xbf16> to vector<64x8xbf16>
    %c0_85 = arith.constant 0 : index
    %c8_86 = arith.constant 8 : index
    %60 = vector.load %arg11[%c0_85, %c8_86] : memref<64x72xbf16, #tpu.memory_space<vmem>>, vector<64x8xbf16>
    tpu.vector_store %arg11[%c0_85, %c8_86], %59 {strides = array<i32>} : memref<64x72xbf16, #tpu.memory_space<vmem>>, vector<64x8xbf16>,
    %c0_87 = arith.constant 0 : index
    %c0_88 = arith.constant 0 : index
    %c2_89 = arith.constant 2 : index
    %c0_90 = arith.constant 0 : index
    %61 = vector.load %arg10[%c0_87, %c0_88, %c2_89, %c0_90] : memref<1x10x10x8xbf16, #tpu.memory_space<vmem>>, vector<1x8x8x8xbf16>
    %62 = vector.shape_cast %61 : vector<1x8x8x8xbf16> to vector<64x8xbf16>
    %c0_91 = arith.constant 0 : index
    %c16_92 = arith.constant 16 : index
    %63 = vector.load %arg11[%c0_91, %c16_92] : memref<64x72xbf16, #tpu.memory_space<vmem>>, vector<64x8xbf16>
    tpu.vector_store %arg11[%c0_91, %c16_92], %62 {strides = array<i32>} : memref<64x72xbf16, #tpu.memory_space<vmem>>, vector<64x8xbf16>,
    %c0_93 = arith.constant 0 : index
    %c1_94 = arith.constant 1 : index
    %c0_95 = arith.constant 0 : index
    %c0_96 = arith.constant 0 : index
    %64 = vector.load %arg10[%c0_93, %c1_94, %c0_95, %c0_96] : memref<1x10x10x8xbf16, #tpu.memory_space<vmem>>, vector<1x8x8x8xbf16>
    %65 = vector.shape_cast %64 : vector<1x8x8x8xbf16> to vector<64x8xbf16>
    %c0_97 = arith.constant 0 : index
    %c24_98 = arith.constant 24 : index
    %66 = vector.load %arg11[%c0_97, %c24_98] : memref<64x72xbf16, #tpu.memory_space<vmem>>, vector<64x8xbf16>
    tpu.vector_store %arg11[%c0_97, %c24_98], %65 {strides = array<i32>} : memref<64x72xbf16, #tpu.memory_space<vmem>>, vector<64x8xbf16>,
    %c0_99 = arith.constant 0 : index
    %c1_100 = arith.constant 1 : index
    %c1_101 = arith.constant 1 : index
    %c0_102 = arith.constant 0 : index
    %67 = vector.load %arg10[%c0_99, %c1_100, %c1_101, %c0_102] : memref<1x10x10x8xbf16, #tpu.memory_space<vmem>>, vector<1x8x8x8xbf16>
    %68 = vector.shape_cast %67 : vector<1x8x8x8xbf16> to vector<64x8xbf16>
    %c0_103 = arith.constant 0 : index
    %c32_104 = arith.constant 32 : index
    %69 = vector.load %arg11[%c0_103, %c32_104] : memref<64x72xbf16, #tpu.memory_space<vmem>>, vector<64x8xbf16>
    tpu.vector_store %arg11[%c0_103, %c32_104], %68 {strides = array<i32>} : memref<64x72xbf16, #tpu.memory_space<vmem>>, vector<64x8xbf16>,
    %c0_105 = arith.constant 0 : index
    %c1_106 = arith.constant 1 : index
    %c2_107 = arith.constant 2 : index
    %c0_108 = arith.constant 0 : index
    %70 = vector.load %arg10[%c0_105, %c1_106, %c2_107, %c0_108] : memref<1x10x10x8xbf16, #tpu.memory_space<vmem>>, vector<1x8x8x8xbf16>
    %71 = vector.shape_cast %70 : vector<1x8x8x8xbf16> to vector<64x8xbf16>
    %c0_109 = arith.constant 0 : index
    %c40 = arith.constant 40 : index
    %72 = vector.load %arg11[%c0_109, %c40] : memref<64x72xbf16, #tpu.memory_space<vmem>>, vector<64x8xbf16>
    tpu.vector_store %arg11[%c0_109, %c40], %71 {strides = array<i32>} : memref<64x72xbf16, #tpu.memory_space<vmem>>, vector<64x8xbf16>,
    %c0_110 = arith.constant 0 : index
    %c2_111 = arith.constant 2 : index
    %c0_112 = arith.constant 0 : index
    %c0_113 = arith.constant 0 : index
    %73 = vector.load %arg10[%c0_110, %c2_111, %c0_112, %c0_113] : memref<1x10x10x8xbf16, #tpu.memory_space<vmem>>, vector<1x8x8x8xbf16>
    %74 = vector.shape_cast %73 : vector<1x8x8x8xbf16> to vector<64x8xbf16>
    %c0_114 = arith.constant 0 : index
    %c48 = arith.constant 48 : index
    %75 = vector.load %arg11[%c0_114, %c48] : memref<64x72xbf16, #tpu.memory_space<vmem>>, vector<64x8xbf16>
    tpu.vector_store %arg11[%c0_114, %c48], %74 {strides = array<i32>} : memref<64x72xbf16, #tpu.memory_space<vmem>>, vector<64x8xbf16>,
    %c0_115 = arith.constant 0 : index
    %c2_116 = arith.constant 2 : index
    %c1_117 = arith.constant 1 : index
    %c0_118 = arith.constant 0 : index
    %76 = vector.load %arg10[%c0_115, %c2_116, %c1_117, %c0_118] : memref<1x10x10x8xbf16, #tpu.memory_space<vmem>>, vector<1x8x8x8xbf16>
    %77 = vector.shape_cast %76 : vector<1x8x8x8xbf16> to vector<64x8xbf16>
    %c0_119 = arith.constant 0 : index
    %c56 = arith.constant 56 : index
    %78 = vector.load %arg11[%c0_119, %c56] : memref<64x72xbf16, #tpu.memory_space<vmem>>, vector<64x8xbf16>
    tpu.vector_store %arg11[%c0_119, %c56], %77 {strides = array<i32>} : memref<64x72xbf16, #tpu.memory_space<vmem>>, vector<64x8xbf16>,
    %c0_120 = arith.constant 0 : index
    %c2_121 = arith.constant 2 : index
    %c2_122 = arith.constant 2 : index
    %c0_123 = arith.constant 0 : index
    %79 = vector.load %arg10[%c0_120, %c2_121, %c2_122, %c0_123] : memref<1x10x10x8xbf16, #tpu.memory_space<vmem>>, vector<1x8x8x8xbf16>
    %80 = vector.shape_cast %79 : vector<1x8x8x8xbf16> to vector<64x8xbf16>
    %c0_124 = arith.constant 0 : index
    %c64 = arith.constant 64 : index
    %81 = vector.load %arg11[%c0_124, %c64] : memref<64x72xbf16, #tpu.memory_space<vmem>>, vector<64x8xbf16>
    tpu.vector_store %arg11[%c0_124, %c64], %80 {strides = array<i32>} : memref<64x72xbf16, #tpu.memory_space<vmem>>, vector<64x8xbf16>,
    %c0_125 = arith.constant 0 : index
    %c0_126 = arith.constant 0 : index
    %82 = vector.load %arg11[%c0_125, %c0_126] : memref<64x72xbf16, #tpu.memory_space<vmem>>, vector<64x72xbf16>
    %c0_127 = arith.constant 0 : index
    %c0_128 = arith.constant 0 : index
    %83 = vector.load %arg5[%c0_127, %c0_128] : memref<72x8xbf16, #tpu.memory_space<vmem>>, vector<72x8xbf16>
    %cst_129 = arith.constant dense<0.000000e+00> : vector<64x8xf32>
    %84 = tpu.matmul %82, %83, %cst_129 {dimension_numbers = #tpu.dot_dimension_numbers<[1], [0], [0], [1], [0, 0, 1, 1], [], []>} : vector<64x72xbf16>, vector<72x8xbf16>, vector<64x8xf32> -> vector<64x8xf32>
    %c0_130 = arith.constant 0 : index
    %c0_131 = arith.constant 0 : index
    %85 = vector.load %arg6[%c0_130, %c0_131] : memref<1x8xf32, #tpu.memory_space<vmem>>, vector<1x8xf32>
    %86 = vector.broadcast %85 : vector<1x8xf32> to vector<64x8xf32>
    %87 = arith.mulf %84, %86 : vector<64x8xf32>
    %c0_132 = arith.constant 0 : index
    %c0_133 = arith.constant 0 : index
    %88 = vector.load %arg7[%c0_132, %c0_133] : memref<1x8xf32, #tpu.memory_space<vmem>>, vector<1x8xf32>
    %89 = vector.broadcast %88 : vector<1x8xf32> to vector<64x8xf32>
    %90 = arith.addf %87, %89 : vector<64x8xf32>
    %cst_134 = arith.constant 0.000000e+00 : f32
    %91 = vector.broadcast %cst_134 : f32 to vector<64x8xf32>
    %92 = arith.maximumf %90, %91 : vector<64x8xf32>
    %93 = vector.shape_cast %92 : vector<64x8xf32> to vector<1x64x8xf32>
    %94 = tpu.transpose %93, [0, 2, 1] : vector<1x64x8xf32> -> vector<1x8x64xf32>
    %c0_135 = arith.constant 0 : index
    %c0_136 = arith.constant 0 : index
    %c0_137 = arith.constant 0 : index
    %95 = vector.load %arg8[%c0_135, %c0_136, %c0_137] : memref<1x8x64xf32, #tpu.memory_space<vmem>>, vector<1x8x64xf32>
    tpu.vector_store %arg8[%c0_135, %c0_136, %c0_137], %94 {strides = array<i32>} : memref<1x8x64xf32, #tpu.memory_space<vmem>>, vector<1x8x64xf32>,
    return
  }
  func.func @transform_0(%arg0: i32) -> (i32, i32, i32, i32, i32) {
    %c0_i32 = arith.constant 0 : i32
    %c0_i32_0 = arith.constant 0 : i32
    %c0_i32_1 = arith.constant 0 : i32
    %c0_i32_2 = arith.constant 0 : i32
    %c0_i32_3 = arith.constant 0 : i32
    return %arg0, %c0_i32, %c0_i32_0, %c0_i32_1, %c0_i32_2 : i32, i32, i32, i32, i32
  }
  func.func @transform_1(%arg0: i32) -> (i32, i32) {
    %c0_i32 = arith.constant 0 : i32
    %c0_i32_0 = arith.constant 0 : i32
    %c0_i32_1 = arith.constant 0 : i32
    return %c0_i32, %c0_i32_0 : i32, i32
  }
  func.func @transform_2(%arg0: i32) -> (i32, i32) {
    %c0_i32 = arith.constant 0 : i32
    %c0_i32_0 = arith.constant 0 : i32
    %c0_i32_1 = arith.constant 0 : i32
    return %c0_i32, %c0_i32_0 : i32, i32
  }
  func.func @transform_3(%arg0: i32) -> (i32, i32) {
    %c0_i32 = arith.constant 0 : i32
    %c0_i32_0 = arith.constant 0 : i32
    %c0_i32_1 = arith.constant 0 : i32
    return %c0_i32, %c0_i32_0 : i32, i32
  }
  func.func @transform_4(%arg0: i32) -> (i32, i32) {
    %c0_i32 = arith.constant 0 : i32
    %c0_i32_0 = arith.constant 0 : i32
    %c0_i32_1 = arith.constant 0 : i32
    return %c0_i32, %c0_i32_0 : i32, i32
  }
  func.func @transform_5(%arg0: i32) -> (i32, i32) {
    %c0_i32 = arith.constant 0 : i32
    %c0_i32_0 = arith.constant 0 : i32
    %c0_i32_1 = arith.constant 0 : i32
    return %c0_i32, %c0_i32_0 : i32, i32
  }
  func.func @transform_6(%arg0: i32) -> (i32, i32) {
    %c0_i32 = arith.constant 0 : i32
    %c0_i32_0 = arith.constant 0 : i32
    %c0_i32_1 = arith.constant 0 : i32
    return %c0_i32, %c0_i32_0 : i32, i32
  }
  func.func @transform_7(%arg0: i32) -> (i32, i32, i32) {
    %c0_i32 = arith.constant 0 : i32
    %c0_i32_0 = arith.constant 0 : i32
    %c0_i32_1 = arith.constant 0 : i32
    return %arg0, %c0_i32, %c0_i32_0 : i32, i32, i32
  }
}

</mosaic_0001>

<bundles_post_ra>
// kernel: down_forward.1
= control target key start
LH: loop header
LB: loop body
LE: loop exit
PB: predicated region body
PF: predicated region fallthrough
CT: control target
= control target key end

     0   :  { %s3173_s24 = smov 0   ;;  %s3865_s0 = inlined_call_operand.vmem [shape: bf16[2,8,2,8,8], index: 0, kind: input, shape index: {}]   ;;  %s3866_s1 = inlined_call_operand.vmem [shape: bf16[36,8], index: 1, kind: input, shape index: {}]   ;;  %s3867_s2 = inlined_call_operand.vmem [shape: f32[1,8], index: 2, kind: input, shape index: {}]   ;;  %s3868_s3 = inlined_call_operand.vmem [shape: f32[1,8], index: 3, kind: input, shape index: {}]   ;;  %s3869_s4 = inlined_call_operand.vmem [shape: bf16[72,8], index: 4, kind: input, shape index: {}]   ;;  %s3870_s5 = inlined_call_operand.vmem [shape: f32[1,8], index: 5, kind: input, shape index: {}]   ;;  %s3871_s6 = inlined_call_operand.vmem [shape: f32[1,8], index: 6, kind: input, shape index: {}]   ;;  %s3872_s7 = inlined_call_operand.vmem [shape: f32[2,8,64], index: 7, kind: output, shape index: {}]  }
   0x1 LB: > { %s2839_s25 = sadd.s32 4294967295, %s3117_s24   ;;  %p2843_p0 = scmp.ge.s32.totalorder %s3117_s24, 1  ;;  %s3117_s24 = sphi %s3173_s24, %s17_s24  }
   0x2   : > { %p237_p1 = scmp.lt.s32.totalorder %s3117_s24, 3 }
   0x4   : > { %p238_p2 = pnand %p2843_p0, %p237_p1 }
   0x5   : > { %p3183_p3 = scmp.lt.s32.totalorder (!%p238_p2), %s2839_s25, 1  ;;  %vm278_vm0 = vcmask (!%p238_p2), 27648   ;;  %vm280_vm1 = vcmask (!%p238_p2), 24576   ;;  %vm300_vm2 = vcmask (!%p238_p2), 60416   ;;  %v3119_v0 = vmov (!%p238_p2), 0   ;;  %s3120_s8 = smov (!%p238_p2), 124  }
   0x6   : > { %241 = sbr.rel (%p238_p2) target bundleno = 1131 (0x46b), region = 48  ;;  %286 = vst.msk [vmem:[#allocation2 + $0x18] sm:$0xf] (!%p238_p2), %vm278_vm0, %v3119_v0  ;;  %vm302_vm3 = vcmask (!%p238_p2), 57344   ;;  %vm468_vm4 = vsmask.f32 (!%p238_p2), 7938 }
   0x7   : > { %287 = vst.msk [vmem:[#allocation2 + $0x1c] sm:$0x1] (!%p238_p2), %vm280_vm1, %v3119_v0  ;;  %281 = vst.msk [vmem:[#allocation2 + $0x4] sm:$0x1] (!%p238_p2), %vm280_vm1, %v3119_v0  ;;  %vm474_vm5 = vsmask.f32 (!%p238_p2), 256 }
   0x8   : > { %279 = vst.msk [vmem:[#allocation2] sm:$0xf] (!%p238_p2), %vm278_vm0, %v3119_v0  ;;  %282 = vst.msk [vmem:[#allocation2 + $0x8] sm:$0xf] (!%p238_p2), %vm278_vm0, %v3119_v0  ;;  %vm750_vm10 = vcmask (!%p238_p2), 1042432   ;;  %vm751_vm11 = vcmask (!%p238_p2), 1046532  }
   0x9   : > { %283 = vst.msk [vmem:[#allocation2 + $0xc] sm:$0x1] (!%p238_p2), %vm280_vm1, %v3119_v0  ;;  %285 = vst.msk [vmem:[#allocation2 + $0x14] sm:$0x1] (!%p238_p2), %vm280_vm1, %v3119_v0  ;;  %vm574_vm12 = vsmask.f32 (!%p238_p2), 3328 }
   0xa   : > { %284 = vst.msk [vmem:[#allocation2 + $0x10] sm:$0xf] (!%p238_p2), %vm278_vm0, %v3119_v0  ;;  %288 = vst.msk [vmem:[#allocation2 + $0x20] sm:$0xf] (!%p238_p2), %vm278_vm0, %v3119_v0  ;;  %vm575_vm13 = vsmask.f32 (!%p238_p2), 7440 }
   0xb   : > { %289 = vst.msk [vmem:[#allocation2 + $0x24] sm:$0x1] (!%p238_p2), %vm280_vm1, %v3119_v0  ;;  %291 = vst.msk [vmem:[#allocation2 + $0x2c] sm:$0x1] (!%p238_p2), %vm280_vm1, %v3119_v0  ;;  %s3121_s9 = smov (!%p238_p2), 12   ;;  %s3122_s10 = smov (!%p238_p2), 24  }
   0xc   : > { %290 = vst.msk [vmem:[#allocation2 + $0x28] sm:$0xf] (!%p238_p2), %vm278_vm0, %v3119_v0  ;;  %292 = vst.msk [vmem:[#allocation2 + $0x30] sm:$0xf] (!%p238_p2), %vm278_vm0, %v3119_v0  ;;  %s3123_s11 = smov (!%p238_p2), 8   ;;  %s3124_s12 = smov (!%p238_p2), 20  }
   0xd   : > { %293 = vst.msk [vmem:[#allocation2 + $0x34] sm:$0x1] %vm280_vm1, %v3119_v0  ;;  %295 = vst.msk [vmem:[#allocation2 + $0x3c] sm:$0x1] %vm280_vm1, %v3119_v0  ;;  %s3887_s25 = smov (!%p3183_p3, %s2839_s25), 1  ;;  %s3125_s13 = smov 32  }
   0xe   : > { %294 = vst.msk [vmem:[#allocation2 + $0x38] sm:$0xf] %vm278_vm0, %v3119_v0  ;;  %296 = vst.msk [vmem:[#allocation2 + $0x40] sm:$0xf] %vm278_vm0, %v3119_v0  ;;  %s2997_s27 = sshll.u32 %s3887_s25, 6  ;;  %s3126_s14 = smov 4  }
   0xf   : > { %297 = vst.msk [vmem:[#allocation2 + $0x44] sm:$0x1] %vm280_vm1, %v3119_v0  ;;  %299 = vst.msk [vmem:[#allocation2 + $0x4c] sm:$0x1] %vm280_vm1, %v3119_v0  ;;  %s272_s30 = scalar_lea.vmem %s3865_s0, %s2997_s27  ;;  %v558_v27 = vld [vmem:[#allocation2] sm:$0xf] }
  0x10   : > { %298 = vst.msk [vmem:[#allocation2 + $0x48] sm:$0xf] %vm278_vm0, %v3119_v0  ;;  %vm3236_vm6 = vmand %vm300_vm2, %vm468_vm4  ;;  %v326_v3 = vld [vmem:[%s272_s30 + $0x10] sm:$0xf]  ;;  %v327_v4 = vld [vmem:[%s272_s30 + $0x14] sm:$0xf] }
  0x11   : > { %301 = vst.msk [vmem:[#allocation3] sm:$0xf] %vm300_vm2, %v3119_v0  ;;  %304 = vst.msk [vmem:[#allocation3 + $0x8] sm:$0xf] %vm300_vm2, %v3119_v0  ;;  %v322_v5 = vld [vmem:[%s272_s30] sm:$0xf]  ;;  %v340_v6 = vmax.bf16 %v327_v4, %v326_v3 }
  0x12   : > { %306 = vst.msk [vmem:[#allocation3 + $0x10] sm:$0xf] %vm300_vm2, %v3119_v0  ;;  %308 = vst.msk [vmem:[#allocation3 + $0x18] sm:$0xf] %vm300_vm2, %v3119_v0  ;;  %v323_v7 = vld [vmem:[%s272_s30 + $0x4] sm:$0xf] }
  0x13   : > { %310 = vst.msk [vmem:[#allocation3 + $0x20] sm:$0xf] %vm300_vm2, %v3119_v0  ;;  %312 = vst.msk [vmem:[#allocation3 + $0x28] sm:$0xf] %vm300_vm2, %v3119_v0  ;;  %v328_v8 = vld [vmem:[%s272_s30 + $0x18] sm:$0xf]  ;;  %v338_v10 = vmax.bf16 %v323_v7, %v322_v5  ;;  %358 = vrot.lane.b32.xlu1 %v340_v6, %s3120_s8 }
  0x14   : > { %314 = vst.msk [vmem:[#allocation3 + $0x30] sm:$0xf] %vm300_vm2, %v3119_v0  ;;  %316 = vst.msk [vmem:[#allocation3 + $0x38] sm:$0xf] %vm300_vm2, %v3119_v0  ;;  %v329_v9 = vld [vmem:[%s272_s30 + $0x1c] sm:$0xf] }
  0x15   : > { %318 = vst.msk [vmem:[#allocation3 + $0x40] sm:$0xf] %vm300_vm2, %v3119_v0  ;;  %320 = vst.msk [vmem:[#allocation3 + $0x48] sm:$0xf] %vm300_vm2, %v3119_v0  ;;  %v324_v11 = vld [vmem:[%s272_s30 + $0x8] sm:$0xf]  ;;  %v341_v13 = vmax.bf16 %v329_v9, %v328_v8  ;;  %354 = vrot.lane.b32.xlu0 %v338_v10, %s3120_s8 }
  0x16   : > { %303 = vst.msk [vmem:[#allocation3 + $0x4] sm:$0x1] %vm302_vm3, %v3119_v0  ;;  %305 = vst.msk [vmem:[#allocation3 + $0xc] sm:$0x1] %vm302_vm3, %v3119_v0  ;;  %v325_v12 = vld [vmem:[%s272_s30 + $0xc] sm:$0xf] }
  0x17   : > { %307 = vst.msk [vmem:[#allocation3 + $0x14] sm:$0x1] %vm302_vm3, %v3119_v0  ;;  %309 = vst.msk [vmem:[#allocation3 + $0x1c] sm:$0x1] %vm302_vm3, %v3119_v0  ;;  %v339_v14 = vmax.bf16 %v325_v12, %v324_v11  ;;  %v332_v15 = vld [vmem:[%s272_s30 + $0x28] sm:$0xf]  ;;  %360 = vrot.lane.b32.xlu1 %v341_v13, %s3120_s8 }
  0x18   : > { %311 = vst.msk [vmem:[#allocation3 + $0x24] sm:$0x1] %vm302_vm3, %v3119_v0  ;;  %313 = vst.msk [vmem:[#allocation3 + $0x2c] sm:$0x1] %vm302_vm3, %v3119_v0  ;;  %v333_v16 = vld [vmem:[%s272_s30 + $0x2c] sm:$0xf] }
  0x19   : > { %315 = vst.msk [vmem:[#allocation3 + $0x34] sm:$0x1] %vm302_vm3, %v3119_v0  ;;  %317 = vst.msk [vmem:[#allocation3 + $0x3c] sm:$0x1] %vm302_vm3, %v3119_v0  ;;  %v330_v17 = vld [vmem:[%s272_s30 + $0x20] sm:$0xf]  ;;  %v343_v19 = vmax.bf16 %v333_v16, %v332_v15  ;;  %356 = vrot.lane.b32.xlu0 %v339_v14, %s3120_s8 }
  0x1a   : > { %319 = vst.msk [vmem:[#allocation3 + $0x44] sm:$0x1] %vm302_vm3, %v3119_v0  ;;  %321 = vst.msk [vmem:[#allocation3 + $0x4c] sm:$0x1] %vm302_vm3, %v3119_v0  ;;  %v331_v18 = vld [vmem:[%s272_s30 + $0x24] sm:$0xf] }
  0x1b   : > { %vm3245_vm7 = vmand %vm302_vm3, %vm474_vm5  ;;  %v3249_v20 = vmax.bf16 %v331_v18, %v330_v17  ;;  %v336_v21 = vld [vmem:[%s272_s30 + $0x38] sm:$0xf]  ;;  %v337_v22 = vld [vmem:[%s272_s30 + $0x3c] sm:$0xf]  ;;  %364 = vrot.lane.b32.xlu1 %v343_v19, %s3120_s8  ;;  %v578_v29 = vshrl.u32 %v558_v27, 16  ;;  %v581_v30 = vshll.u32 %v558_v27, 16 }
  0x1c   : > { %v334_v23 = vld [vmem:[%s272_s30 + $0x30] sm:$0xf]  ;;  %v335_v24 = vld [vmem:[%s272_s30 + $0x34] sm:$0xf]  ;;  %v3251_v25 = vmax.bf16 %v337_v22, %v336_v21  ;;  %v1169_v28 = vld [vmem:[#allocation2 + $0x48] sm:$0xf] }
  0x1d   : > { %362 = vrot.lane.b32.xlu0 %v3249_v20, %s3120_s8  ;;  %v3254_v26 = vmax.bf16 %v335_v24, %v334_v23  ;;  %v1270_v31 = vshrl.u32 %v1169_v28, 16  ;;  %v1273_v32 = vshll.u32 %v1169_v28, 16  ;;  %v3258_v36 = vld [vmem:[#allocation2] sm:$0xe]  ;;  %v3260_v37 = vrot.slane %v578_v29, 4  ;;  %vm3276_vm8 = vmand %vm278_vm0, %vm468_vm4  ;;  %s3127_s15 = smov 16  }
  0x1e   : > { %v3262_v38 = vrot.slane %v581_v30, 5  ;;  %v3264_v40 = vld [vmem:[#allocation2 + $0x4] sm:$0x1]  ;;  %v2855_v47 = vrot.slane %v3258_v36, 9  ;;  %v485_v48 = vld [vmem:[#allocation2 + $0x18] sm:$0xf]  ;;  %vm3284_vm9 = vmand %vm280_vm1, %vm474_vm5 }
  0x1f   : > { %368 = vrot.lane.b32.xlu1 %v3251_v25, %s3120_s8  ;;  %v3266_v41 = vrot.slane %v1270_v31, 4  ;;  %v3268_v42 = vrot.slane %v1273_v32, 5  ;;  %v587_v53 = vshll.u32 %v3264_v40, 16  ;;  %v488_v55 = vld [vmem:[#allocation2 + $0x1c] sm:$0x1]  ;;  %vm3350_vm14 = vmor %vm750_vm10, %vm751_vm11  ;;  %s3128_s18 = smov 28  }
  0x20   : > { %v584_v52 = vor.u32 %v3262_v38, %v3260_v37  ;;  %v470_v56 = vld [vmem:[#allocation2 + $0x8] sm:$0xf]  ;;  %v476_v0 = vld [vmem:[#allocation2 + $0xc] sm:$0x1]  ;;  %v491_v12 = vld [vmem:[#allocation2 + $0x20] sm:$0xf] }
  0x21   : > { %366 = vrot.lane.b32.xlu0 %v3254_v26, %s3120_s8  ;;  %v1276_v60 = vor.u32 %v3268_v42, %v3266_v41  ;;  %v494_v18 = vld [vmem:[#allocation2 + $0x24] sm:$0x1]  ;;  %v479_v21 = vld [vmem:[#allocation2 + $0x10] sm:$0xf]  ;;  %v482_v28 = vld [vmem:[#allocation2 + $0x14] sm:$0x1] }
  0x22   : > { %vm3358_vm15 = vmor %vm574_vm12, %vm575_vm13  ;;  %vm553_vm0 = vcmask 31744   ;;  %vm1442_vm1 = vcmask 1041408   ;;  %vm713_vm2 = vcmask 64544   ;;  %vm809_vm3 = vcmask 97344   ;;  %s3129_s29 = smov 48   ;;  %s3130_s30 = smov 40  }
  0x23   : > { %v3335_v37 = vrot.slane %v1276_v60, 4  ;;  %vm854_vm4 = vcmask 130144   ;;  %vm1011_vm5 = vcmask 162944   ;;  %vm1307_vm10 = vcmask 261344   ;;  %s3131_s8 = smov 64   ;;  %s3132_s20 = smov 56  }
  0x24   : > { %vm1400_vm11 = vcmask 294144   ;;  %vm1429_vm12 = vcmask 293888   ;;  %vm1903_vm13 = vcmask 130112   ;;  %s2846_s26 = sshll.u32 %s3887_s25, 3 }
  0x85   : > { %v359_v33 = vpop.permute.xlu1 %358 }
  0x86   : > { %v380_v34 = vmax.bf16 %v359_v33, %v340_v6 }
  0x87   : > { %v355_v35 = vpop.permute.xlu0 %354 }
  0x88   : > { %v378_v39 = vmax.bf16 %v355_v35, %v338_v10  ;;  %v403_v43 = vshrl.u32 %v380_v34, 16  ;;  %v406_v44 = vshll.u32 %v380_v34, 16 }
  0x89   : > { %v361_v46 = vpop.permute.xlu1 %360 }
  0x8a   : > { %v387_v45 = vshrl.u32 %v378_v39, 16  ;;  %v405_v49 = vrot.slane %v403_v43, 7  ;;  %v381_v50 = vmax.bf16 %v361_v46, %v341_v13  ;;  %v390_v58 = vshll.u32 %v378_v39, 16  ;;  %v503_v43 = vld [vmem:[#allocation2 + $0x30] sm:$0xf] }
  0x8b   : > { %v357_v51 = vpop.permute.xlu0 %356 }
  0x8c   : > { %v389_v57 = vrot.slane %v387_v45, 7  ;;  %v379_v59 = vmax.bf16 %v357_v51, %v339_v14  ;;  %v408_v62 = vor.u32 %v406_v44, %v405_v49  ;;  %v409_v63 = vrot.slane %v405_v49, 4 }
  0x8d   : > { %v411_v3 = vshrl.u32 %v381_v50, 16  ;;  %v414_v4 = vshll.u32 %v381_v50, 16  ;;  %v365_v9 = vpop.permute.xlu1 %364  ;;  %v497_v50 = vld [vmem:[#allocation2 + $0x28] sm:$0xf] }
  0x8e   : > { %v392_v5 = vor.u32 %v390_v58, %v389_v57  ;;  %v393_v6 = vrot.slane %v389_v57, 4  ;;  %v395_v7 = vshrl.u32 %v379_v59, 16  ;;  %v398_v8 = vshll.u32 %v379_v59, 16 }
  0x8f   : > { %v486_v10 = vsel %vm3276_vm8, %v408_v62, %v485_v48  ;;  %v489_v11 = vsel %vm3284_vm9, %v409_v63, %v488_v55  ;;  %v413_v13 = vrot.slane %v411_v3, 7  ;;  %v383_v14 = vmax.bf16 %v365_v9, %v343_v19  ;;  %v363_v15 = vpop.permute.xlu0 %362  ;;  %v515_v3 = vld [vmem:[#allocation2 + $0x40] sm:$0xf] }
  0x90   : > { %487 = vst [vmem:[#allocation2 + $0x18] sm:$0xf] %v486_v10  ;;  %490 = vst [vmem:[#allocation2 + $0x1c] sm:$0x1] %v489_v11  ;;  %v471_v16 = vsel %vm3276_vm8, %v392_v5, %v470_v56  ;;  %v477_v17 = vsel %vm3284_vm9, %v393_v6, %v476_v0  ;;  %v397_v22 = vrot.slane %v395_v7, 7  ;;  %v382_v23 = vmax.bf16 %v363_v15, %v3249_v20 }
  0x91   : > { %472 = vst [vmem:[#allocation2 + $0x8] sm:$0xf] %v471_v16  ;;  %478 = vst [vmem:[#allocation2 + $0xc] sm:$0x1] %v477_v17  ;;  %v416_v24 = vor.u32 %v414_v4, %v413_v13  ;;  %v417_v27 = vrot.slane %v413_v13, 4  ;;  %v427_v19 = vshrl.u32 %v383_v14, 16  ;;  %v369_v34 = vpop.permute.xlu1 %368 }
  0x92   : > { %v430_v29 = vshll.u32 %v383_v14, 16  ;;  %v400_v30 = vor.u32 %v398_v8, %v397_v22  ;;  %v401_v31 = vrot.slane %v397_v22, 4  ;;  %v419_v32 = vshrl.u32 %v382_v23, 16  ;;  %v506_v20 = vld [vmem:[#allocation2 + $0x34] sm:$0x1] }
  0x93   : > { %v422_v33 = vshll.u32 %v382_v23, 16  ;;  %v492_v35 = vsel %vm3276_vm8, %v416_v24, %v491_v12  ;;  %v495_v39 = vsel %vm3284_vm9, %v417_v27, %v494_v18  ;;  %v429_v44 = vrot.slane %v427_v19, 7  ;;  %v367_v46 = vpop.permute.xlu0 %366  ;;  %v3307_v56 = vld [vmem:[#allocation2 + $0x4] sm:$0x1]  ;;  %v3309_v7 = vld [vmem:[#allocation2 + $0x4c] sm:$0x1] }
  0x94   : > { %v385_v45 = vmax.bf16 %v369_v34, %v3251_v25  ;;  %493 = vst [vmem:[#allocation2 + $0x20] sm:$0xf] %v492_v35  ;;  %496 = vst [vmem:[#allocation2 + $0x24] sm:$0x1] %v495_v39  ;;  %v480_v48 = vsel %vm3276_vm8, %v400_v30, %v479_v21  ;;  %v483_v49 = vsel %vm3284_vm9, %v401_v31, %v482_v28  ;;  %v421_v51 = vrot.slane %v419_v32, 7 }
  0x95   : > { %v384_v55 = vmax.bf16 %v367_v46, %v3254_v26  ;;  %481 = vst [vmem:[#allocation2 + $0x10] sm:$0xf] %v480_v48  ;;  %484 = vst [vmem:[#allocation2 + $0x14] sm:$0x1] %v483_v49  ;;  %v432_v57 = vor.u32 %v430_v29, %v429_v44  ;;  %v433_v58 = vrot.slane %v429_v44, 4  ;;  %v755_v12 = vrot.slane %v3307_v56, 5 }
  0x96   : > { %v500_v25 = vld [vmem:[#allocation2 + $0x2c] sm:$0x1]  ;;  %v443_v59 = vshrl.u32 %v385_v45, 16  ;;  %v446_v62 = vshll.u32 %v385_v45, 16  ;;  %v424_v63 = vor.u32 %v422_v33, %v421_v51  ;;  %v425_v0 = vrot.slane %v421_v51, 4 }
  0x97   : > { %v518_v4 = vld [vmem:[#allocation2 + $0x44] sm:$0x1]  ;;  %v435_v5 = vshrl.u32 %v384_v55, 16  ;;  %v438_v6 = vshll.u32 %v384_v55, 16  ;;  %v504_v26 = vsel %vm3276_vm8, %v432_v57, %v503_v43  ;;  %v507_v8 = vsel %vm3284_vm9, %v433_v58, %v506_v20  ;;  %v509_v10 = vld [vmem:[#allocation2 + $0x38] sm:$0xf] }
  0x98   : > { %v445_v9 = vrot.slane %v443_v59, 7  ;;  %v512_v11 = vld [vmem:[#allocation2 + $0x3c] sm:$0x1]  ;;  %505 = vst [vmem:[#allocation2 + $0x30] sm:$0xf] %v504_v26  ;;  %v498_v13 = vsel %vm3276_vm8, %v424_v63, %v497_v50  ;;  %v501_v14 = vsel %vm3284_vm9, %v425_v0, %v500_v25  ;;  %v3323_v16 = vrot.slane %v584_v52, 4 }
  0x99   : > { %508 = vst [vmem:[#allocation2 + $0x34] sm:$0x1] %v507_v8  ;;  %v437_v15 = vrot.slane %v435_v5, 7  ;;  %499 = vst [vmem:[#allocation2 + $0x28] sm:$0xf] %v498_v13  ;;  %v3327_v22 = vrot.slane %v587_v53, 5 }
  0x9a   : > { %502 = vst [vmem:[#allocation2 + $0x2c] sm:$0x1] %v501_v14  ;;  %v448_v17 = vor.u32 %v446_v62, %v445_v9  ;;  %v449_v18 = vrot.slane %v445_v9, 4  ;;  %v720_v21 = vld [vmem:[#allocation2 + $0x8] sm:$0xe]  ;;  %v1279_v23 = vshll.u32 %v3309_v7, 16 }
  0x9b   : > { %v440_v24 = vor.u32 %v438_v6, %v437_v15  ;;  %v441_v27 = vrot.slane %v437_v15, 4  ;;  %v721_v28 = vld [vmem:[#allocation2 + $0xc] sm:$0x1]  ;;  %v3330_v19 = vld [vmem:[#allocation2 + $0x18] sm:$0xe]  ;;  %v2856_v41 = vrot.slane %v720_v21, 9  ;;  %v756_v6 = vsel %vm3350_vm14, %v2855_v47, %v755_v12 }
  0x9c   : > { %v516_v38 = vsel %vm3276_vm8, %v448_v17, %v515_v3  ;;  %v519_v40 = vsel %vm3284_vm9, %v449_v18, %v518_v4  ;;  %v3079_v52 = vld [vmem:[#allocation2 + $0x18] ss:$8 sps:$4 sm:$0xff]   ;;  %v3080_v30 = vld [vmem:[#allocation2 + $0x8] ss:$8 sps:$4 sm:$0xff]   ;;  %v759_v42 = vrot.slane %v721_v28, 5  ;;  %v2858_v54 = vrot.slane %v3330_v19, 9 }
  0x9d   : > { %517 = vst [vmem:[#allocation2 + $0x40] sm:$0xf] %v516_v38  ;;  %520 = vst [vmem:[#allocation2 + $0x44] sm:$0x1] %v519_v40  ;;  %v510_v53 = vsel %vm3276_vm8, %v440_v24, %v509_v10  ;;  %v513_v29 = vsel %vm3284_vm9, %v441_v27, %v512_v11  ;;  %844 = vrot.lane.b32.xlu1 %v3079_v52, %s3121_s9  ;;  %v722_v60 = vld [vmem:[#allocation2 + $0x10] sm:$0xe]  ;;  %842 = vrot.lane.b32.xlu0 %v3080_v30, %s3121_s9 }
  0x9e   : > { %511 = vst [vmem:[#allocation2 + $0x38] sm:$0xf] %v510_v53  ;;  %514 = vst [vmem:[#allocation2 + $0x3c] sm:$0x1] %v513_v29  ;;  %v725_v31 = vld [vmem:[#allocation2 + $0x1c] sm:$0x1]  ;;  %v760_v26 = vsel %vm3350_vm14, %v2856_v41, %v759_v42  ;;  %v590_v56 = vsel %vm3358_vm15, %v3323_v16, %v3327_v22 }
  0x9f   : > { %v3081_v32 = vld [vmem:[#allocation2 + $0x10] ss:$8 sps:$4 sm:$0xff]   ;;  %v723_v33 = vld [vmem:[#allocation2 + $0x14] sm:$0x1]  ;;  %v2857_v34 = vrot.slane %v722_v60, 9  ;;  %v767_v44 = vrot.slane %v725_v31, 5  ;;  %v2863_v27 = vcombine.low %v756_v6, %v760_v26 }
  0xa0   : > { %v1016_v35 = vld [vmem:[#allocation2 + $0x8] sm:$0xe]  ;;  %v1017_v61 = vld [vmem:[#allocation2 + $0xc] sm:$0x1]  ;;  %v763_v20 = vrot.slane %v723_v33, 5  ;;  %vm1104_vm8 = vcmask 195744  }
  0xa1   : > { %v3082_v39 = vld [vmem:[#allocation2 + $0x20] ss:$8 sps:$4 sm:$0xff]   ;;  %v1018_v45 = vld [vmem:[#allocation2 + $0x10] sm:$0xe]  ;;  %v1019_v46 = vld [vmem:[#allocation2 + $0x14] sm:$0x1]  ;;  %1138 = vrot.lane.b32.xlu0 %v3081_v32, %s3122_s10  ;;  %v768_v28 = vsel %vm3350_vm14, %v2858_v54, %v767_v44 }
  0xa2   : > { %1140 = vrot.lane.b32.xlu1 %v3082_v39, %s3122_s10  ;;  %v3083_v48 = vld [vmem:[#allocation2 + $0x28] ss:$8 sps:$4 sm:$0xff]   ;;  %v2875_v49 = vrot.slane %v1016_v35, 9  ;;  %v1050_v50 = vrot.slane %v1017_v61, 5  ;;  %v2876_v51 = vrot.slane %v1018_v45, 9  ;;  %v1054_v55 = vrot.slane %v1019_v46, 5 }
  0xa3   : > { %v1020_v58 = vld [vmem:[#allocation2 + $0x18] sm:$0xe]  ;;  %v1021_v62 = vld [vmem:[#allocation2 + $0x1c] sm:$0x1]  ;;  %v1022_v63 = vld [vmem:[#allocation2 + $0x20] sm:$0xe]  ;;  %v764_v36 = vsel %vm3350_vm14, %v2857_v34, %v763_v20 }
  0xa4   : > { %v3086_v59 = vld [vmem:[#allocation2 + $0x40] ss:$8 sps:$4 sm:$0xff]   ;;  %v1023_v3 = vld [vmem:[#allocation2 + $0x24] sm:$0x1]  ;;  %v2877_v4 = vrot.slane %v1020_v58, 9  ;;  %v1058_v5 = vrot.slane %v1021_v62, 5  ;;  %v1055_v47 = vsel %vm3350_vm14, %v2876_v51, %v1054_v55  ;;  %v1051_v53 = vsel %vm3350_vm14, %v2875_v49, %v1050_v50 }
  0xa5   : > { %v3084_v25 = vld [vmem:[#allocation2 + $0x38] ss:$8 sps:$4 sm:$0xff]   ;;  %846 = vrot.lane.b32.xlu0 %v3083_v48, %s3121_s9  ;;  %v2878_v8 = vrot.slane %v1022_v63, 9  ;;  %v1062_v9 = vrot.slane %v1023_v3, 5  ;;  %v1312_v10 = vld [vmem:[#allocation2 + $0x10] sm:$0xe]  ;;  %v2864_v31 = vcombine.low %v764_v36, %v768_v28  ;;  %v2883_v32 = vcombine.low %v1051_v53, %v1055_v47 }
  0xa6   : > { %848 = vrot.lane.b32.xlu1 %v3084_v25, %s3121_s9  ;;  %v3085_v0 = vld [vmem:[#allocation2 + $0x30] ss:$8 sps:$4 sm:$0xff]   ;;  %v1313_v11 = vld [vmem:[#allocation2 + $0x14] sm:$0x1]  ;;  %v1315_v14 = vld [vmem:[#allocation2 + $0x1c] sm:$0x1]  ;;  %v1059_v61 = vsel %vm3350_vm14, %v2877_v4, %v1058_v5 }
  0xa7   : > { %v1314_v13 = vld [vmem:[#allocation2 + $0x18] sm:$0xe]  ;;  %v2895_v15 = vrot.slane %v1312_v10, 9  ;;  %v1346_v17 = vrot.slane %v1313_v11, 5  ;;  %v1350_v18 = vrot.slane %v1315_v14, 5  ;;  %v1063_v29 = vsel %vm3350_vm14, %v2878_v8, %v1062_v9 }
  0xa8   : > { %v2896_v12 = vrot.slane %v1314_v13, 9  ;;  %v730_v21 = vld [vmem:[#allocation2 + $0x30] sm:$0xe]  ;;  %v731_v24 = vld [vmem:[#allocation2 + $0x34] sm:$0x1]  ;;  %v2884_v48 = vcombine.low %v1059_v61, %v1063_v29  ;;  %vm1150_vm9 = vcmask 228544  }
  0xa9   : > { %1142 = vrot.lane.b32.xlu0 %v3085_v0, %s3122_s10  ;;  %v732_v19 = vld [vmem:[#allocation2 + $0x38] sm:$0xe]  ;;  %v733_v38 = vld [vmem:[#allocation2 + $0x3c] sm:$0x1]  ;;  %v2861_v40 = vrot.slane %v730_v21, 9  ;;  %v779_v52 = vrot.slane %v731_v24, 5  ;;  %v1347_v39 = vsel %vm3350_vm14, %v2895_v15, %v1346_v17 }
  0xaa   : > { %1144 = vrot.lane.b32.xlu1 %v3086_v59, %s3122_s10  ;;  %v2862_v30 = vrot.slane %v732_v19, 9  ;;  %v783_v41 = vrot.slane %v733_v38, 5  ;;  %v1316_v42 = vld [vmem:[#allocation2 + $0x20] sm:$0xe]  ;;  %v1317_v60 = vld [vmem:[#allocation2 + $0x24] sm:$0x1]  ;;  %v1351_v49 = vsel %vm3350_vm14, %v2896_v12, %v1350_v18 }
  0xab   : > { %v1318_v33 = vld [vmem:[#allocation2 + $0x28] sm:$0xe]  ;;  %v1319_v34 = vld [vmem:[#allocation2 + $0x2c] sm:$0x1]  ;;  %v2897_v35 = vrot.slane %v1316_v42, 9  ;;  %v1354_v54 = vrot.slane %v1317_v60, 5  ;;  %v2903_v4 = vcombine.low %v1347_v39, %v1351_v49  ;;  %v780_v5 = vsel %vm3350_vm14, %v2861_v40, %v779_v52 }
  0xac   : > { %v2898_v20 = vrot.slane %v1318_v33, 9  ;;  %v1358_v44 = vrot.slane %v1319_v34, 5  ;;  %v1028_v45 = vld [vmem:[#allocation2 + $0x38] sm:$0xe]  ;;  %v1029_v46 = vld [vmem:[#allocation2 + $0x3c] sm:$0x1]  ;;  %v784_v25 = vsel %vm3350_vm14, %v2862_v30, %v783_v41 }
  0xad   : > { %797 = vrot.lane.b32.xlu0 %v2863_v27, %s3123_s11  ;;  %v1030_v50 = vld [vmem:[#allocation2 + $0x40] sm:$0xe]  ;;  %v1031_v51 = vld [vmem:[#allocation2 + $0x44] sm:$0x1]  ;;  %v2881_v55 = vrot.slane %v1028_v45, 9  ;;  %v1074_v58 = vrot.slane %v1029_v46, 5  ;;  %v1355_v6 = vsel %vm3350_vm14, %v2897_v35, %v1354_v54  ;;  %v2866_v36 = vcombine.low %v780_v5, %v784_v25 }
  0xae   : > { %799 = vrot.lane.b32.xlu1 %v2864_v31, %s3123_s11  ;;  %v3400_v59 = vsel %vm3350_vm14, %v2898_v20, %v1358_v44  ;;  %v2882_v62 = vrot.slane %v1030_v50, 9  ;;  %v1078_v63 = vrot.slane %v1031_v51, 5  ;;  %v726_v0 = vld [vmem:[#allocation2 + $0x20] sm:$0xe]  ;;  %v727_v3 = vld [vmem:[#allocation2 + $0x24] sm:$0x1] }
  0xaf   : > { %v728_v26 = vld [vmem:[#allocation2 + $0x28] sm:$0xe]  ;;  %v729_v8 = vld [vmem:[#allocation2 + $0x2c] sm:$0x1]  ;;  %v2859_v9 = vrot.slane %v726_v0, 9  ;;  %v1075_v10 = vsel %vm3350_vm14, %v2881_v55, %v1074_v58  ;;  %v2904_v47 = vcombine.low %v1355_v6, %v3400_v59  ;;  %v771_v27 = vrot.slane %v727_v3, 5 }
  0xb0   : > { %v1079_v11 = vsel %vm3350_vm14, %v2882_v62, %v1078_v63  ;;  %v2860_v13 = vrot.slane %v728_v26, 9  ;;  %v775_v14 = vrot.slane %v729_v8, 5  ;;  %v562_v15 = vld [vmem:[#allocation2 + $0x10] sm:$0xf]  ;;  %v563_v17 = vld [vmem:[#allocation2 + $0x14] sm:$0x1] }
  0xb1   : > { %1092 = vrot.lane.b32.xlu0 %v2883_v32, %s3124_s12  ;;  %v564_v12 = vld [vmem:[#allocation2 + $0x18] sm:$0xf]  ;;  %v565_v18 = vld [vmem:[#allocation2 + $0x1c] sm:$0x1]  ;;  %v606_v21 = vshrl.u32 %v562_v15, 16  ;;  %v609_v24 = vshll.u32 %v562_v15, 16  ;;  %v2886_v52 = vcombine.low %v1075_v10, %v1079_v11  ;;  %v772_v20 = vsel %vm3350_vm14, %v2859_v9, %v771_v27 }
  0xb2   : > { %1094 = vrot.lane.b32.xlu1 %v2884_v48, %s3124_s12  ;;  %v615_v28 = vshll.u32 %v563_v17, 16  ;;  %v620_v19 = vshrl.u32 %v564_v12, 16  ;;  %v623_v38 = vshll.u32 %v564_v12, 16  ;;  %v1024_v40 = vld [vmem:[#allocation2 + $0x28] sm:$0xe]  ;;  %v629_v30 = vshll.u32 %v565_v18, 16 }
  0xb3   : > { %v608_v53 = vrot.slane %v606_v21, 4  ;;  %v611_v29 = vrot.slane %v609_v24, 5  ;;  %v1025_v41 = vld [vmem:[#allocation2 + $0x2c] sm:$0x1]  ;;  %v776_v42 = vsel %vm3350_vm14, %v2860_v13, %v775_v14  ;;  %v1026_v32 = vld [vmem:[#allocation2 + $0x30] sm:$0xe] }
  0xb4   : > { %v622_v60 = vrot.slane %v620_v19, 4  ;;  %v625_v31 = vrot.slane %v623_v38, 5  ;;  %v2879_v33 = vrot.slane %v1024_v40, 9  ;;  %v617_v35 = vrot.slane %v615_v28, 5  ;;  %v1027_v54 = vld [vmem:[#allocation2 + $0x34] sm:$0x1] }
  0xb5   : > { %1388 = vrot.lane.b32.xlu0 %v2903_v4, %s3125_s13  ;;  %v612_v34 = vor.u32 %v611_v29, %v608_v53  ;;  %v1066_v61 = vrot.slane %v1025_v41, 5  ;;  %v2880_v39 = vrot.slane %v1026_v32, 9  ;;  %v631_v45 = vrot.slane %v629_v30, 5  ;;  %v863_v48 = vld [vmem:[#allocation2 + $0x18] sm:$0xf] }
  0xb6   : > { %803 = vrot.lane.b32.xlu1 %v2866_v36, %s3123_s11  ;;  %v626_v44 = vor.u32 %v625_v31, %v622_v60  ;;  %v1070_v46 = vrot.slane %v1027_v54, 5  ;;  %v864_v49 = vld [vmem:[#allocation2 + $0x1c] sm:$0x1]  ;;  %v2865_v50 = vcombine.low %v772_v20, %v776_v42  ;;  %v865_v58 = vld [vmem:[#allocation2 + $0x20] sm:$0xf]  ;;  %v904_v59 = vshrl.u32 %v863_v48, 16 }
  0xb7   : > { %v613_v51 = vrot.slane %v612_v34, 4  ;;  %v1067_v55 = vsel %vm3350_vm14, %v2879_v33, %v1066_v61  ;;  %v866_v25 = vld [vmem:[#allocation2 + $0x24] sm:$0x1]  ;;  %v907_v0 = vshll.u32 %v863_v48, 16  ;;  %v913_v3 = vshll.u32 %v864_v49, 16 }
  0xb8   : > { %v627_v62 = vrot.slane %v626_v44, 4  ;;  %v1071_v63 = vsel %vm3350_vm14, %v2880_v39, %v1070_v46  ;;  %v560_v4 = vld [vmem:[#allocation2 + $0x8] sm:$0xf]  ;;  %v906_v26 = vrot.slane %v904_v59, 4  ;;  %v918_v8 = vshrl.u32 %v865_v58, 16 }
  0xb9   : > { %1390 = vrot.lane.b32.xlu0 %v2904_v47, %s3125_s13  ;;  %v618_v5 = vsel %vm3358_vm15, %v613_v51, %v617_v35  ;;  %v2885_v6 = vcombine.low %v1067_v55, %v1071_v63  ;;  %v561_v9 = vld [vmem:[#allocation2 + $0xc] sm:$0x1]  ;;  %v909_v11 = vrot.slane %v907_v0, 5  ;;  %v915_v13 = vrot.slane %v913_v3, 5  ;;  %v1159_v15 = vld [vmem:[#allocation2 + $0x20] sm:$0xf] }
  0xba   : > { %1098 = vrot.lane.b32.xlu1 %v2886_v52, %s3124_s12  ;;  %v632_v10 = vsel %vm3358_vm15, %v627_v62, %v631_v45  ;;  %v921_v14 = vshll.u32 %v865_v58, 16  ;;  %v920_v36 = vrot.slane %v918_v8, 4  ;;  %v927_v12 = vshll.u32 %v866_v25, 16  ;;  %v1160_v18 = vld [vmem:[#allocation2 + $0x24] sm:$0x1] }
  0xbb   : > { %v2852_v17 = vcombine.low %v618_v5, %v632_v10  ;;  %v592_v47 = vshrl.u32 %v560_v4, 16  ;;  %v910_v21 = vor.u32 %v909_v11, %v906_v26  ;;  %v595_v27 = vshll.u32 %v560_v4, 16  ;;  %v1161_v19 = vld [vmem:[#allocation2 + $0x28] sm:$0xf]  ;;  %v1162_v60 = vld [vmem:[#allocation2 + $0x2c] sm:$0x1] }
  0xbc   : > { %v923_v24 = vrot.slane %v921_v14, 5  ;;  %v601_v28 = vshll.u32 %v561_v9, 16  ;;  %v929_v38 = vrot.slane %v927_v12, 5  ;;  %v1200_v52 = vshrl.u32 %v1159_v15, 16  ;;  %v859_v35 = vld [vmem:[#allocation2 + $0x8] sm:$0xf] }
  0xbd   : > { %801 = vrot.lane.b32.xlu0 %v2865_v50, %s3123_s11  ;;  %v594_v40 = vrot.slane %v592_v47, 4  ;;  %v1203_v53 = vshll.u32 %v1159_v15, 16  ;;  %v911_v29 = vrot.slane %v910_v21, 4  ;;  %v597_v41 = vrot.slane %v595_v27, 5  ;;  %v860_v49 = vld [vmem:[#allocation2 + $0xc] sm:$0x1] }
  0xbe   : > { %703 = vrot.lane.b32.xlu1 %v2852_v17, %s3126_s14  ;;  %v924_v30 = vor.u32 %v923_v24, %v920_v36  ;;  %v603_v42 = vrot.slane %v601_v28, 5  ;;  %v1202_v31 = vrot.slane %v1200_v52, 4  ;;  %v1209_v33 = vshll.u32 %v1160_v18, 16  ;;  %v861_v58 = vld [vmem:[#allocation2 + $0x10] sm:$0xf] }
  0xbf   : > { %v1205_v32 = vrot.slane %v1203_v53, 5  ;;  %v1214_v34 = vshrl.u32 %v1161_v19, 16  ;;  %v916_v54 = vsel %vm3358_vm15, %v911_v29, %v915_v13  ;;  %v598_v39 = vor.u32 %v597_v41, %v594_v40  ;;  %v862_v0 = vld [vmem:[#allocation2 + $0x14] sm:$0x1]  ;;  %v566_v8 = vld [vmem:[#allocation2 + $0x20] sm:$0xf] }
  0xc0   : > { %v925_v61 = vrot.slane %v924_v30, 4  ;;  %v1217_v20 = vshll.u32 %v1161_v19, 16  ;;  %v1211_v45 = vrot.slane %v1209_v33, 5  ;;  %v1223_v48 = vshll.u32 %v1162_v60, 16  ;;  %v567_v14 = vld [vmem:[#allocation2 + $0x24] sm:$0x1] }
  0xc1   : > { %1096 = vrot.lane.b32.xlu0 %v2885_v6, %s3124_s12  ;;  %v1206_v44 = vor.u32 %v1205_v32, %v1202_v31  ;;  %v1216_v46 = vrot.slane %v1214_v34, 4  ;;  %v599_v51 = vrot.slane %v598_v39, 4  ;;  %v876_v25 = vshrl.u32 %v859_v35, 16  ;;  %v568_v47 = vld [vmem:[#allocation2 + $0x28] sm:$0xf]  ;;  %v3090_v32 = vld [vmem:[%s3866_s1] sm:$0xff]  }
  0xc2   : > { %v930_v50 = vsel %vm3358_vm15, %v925_v61, %v929_v38  ;;  %v1219_v55 = vrot.slane %v1217_v20, 5  ;;  %v1225_v63 = vrot.slane %v1223_v48, 5  ;;  %v879_v3 = vshll.u32 %v859_v35, 16  ;;  %v569_v24 = vld [vmem:[#allocation2 + $0x2c] sm:$0x1]  ;;  %3022 = vmatprep.subr.bf16.mxu0 %v3090_v32 }
  0xc3   : > { %v2872_v59 = vcombine.low %v916_v54, %v930_v50  ;;  %v1207_v62 = vrot.slane %v1206_v44, 4  ;;  %v604_v4 = vsel %vm3358_vm15, %v599_v51, %v603_v42  ;;  %v878_v6 = vrot.slane %v876_v25, 4  ;;  %v1155_v38 = vld [vmem:[#allocation2 + $0x10] sm:$0xf]  ;;  %v1156_v31 = vld [vmem:[#allocation2 + $0x14] sm:$0x1]  ;;  %3023 = vmatpush3.bf16.msra.mxu0 %v3090_v32 }
  0xc4   : > { %v1220_v5 = vor.u32 %v1219_v55, %v1216_v46  ;;  %v885_v26 = vshll.u32 %v860_v49, 16  ;;  %v2851_v9 = vcombine.low %v590_v56, %v604_v4  ;;  %v881_v11 = vrot.slane %v879_v3, 5  ;;  %v1157_v54 = vld [vmem:[#allocation2 + $0x18] sm:$0xf]  ;;  %v1158_v49 = vld [vmem:[#allocation2 + $0x1c] sm:$0x1] }
  0xc5   : > { %1001 = vrot.lane.b32.xlu1 %v2872_v59, %s3127_s15  ;;  %v1212_v10 = vsel %vm3358_vm15, %v1207_v62, %v1211_v45  ;;  %v890_v13 = vshrl.u32 %v861_v58, 16  ;;  %v893_v36 = vshll.u32 %v861_v58, 16  ;;  %v899_v12 = vshll.u32 %v862_v0, 16  ;;  %v570_v62 = vld [vmem:[#allocation2 + $0x30] sm:$0xf] }
  0xc6   : > { %v1221_v15 = vrot.slane %v1220_v5, 4  ;;  %v887_v17 = vrot.slane %v885_v26, 5  ;;  %701 = vrot.lane.b32.xlu0 %v2851_v9, %s3126_s14  ;;  %v882_v18 = vor.u32 %v881_v11, %v878_v6  ;;  %v634_v27 = vshrl.u32 %v566_v8, 16  ;;  %v572_v6 = vld [vmem:[#allocation2 + $0x38] sm:$0xf] }
  0xc7   : > { %v892_v21 = vrot.slane %v890_v13, 4  ;;  %v637_v28 = vshll.u32 %v566_v8, 16  ;;  %v895_v22 = vrot.slane %v893_v36, 5  ;;  %v901_v56 = vrot.slane %v899_v12, 5  ;;  %v573_v13 = vld [vmem:[#allocation2 + $0x3c] sm:$0x1] }
  0xc8   : > { %v1226_v16 = vsel %vm3358_vm15, %v1221_v15, %v1225_v63  ;;  %v643_v19 = vshll.u32 %v567_v14, 16  ;;  %v883_v52 = vrot.slane %v882_v18, 4  ;;  %v636_v53 = vrot.slane %v634_v27, 4  ;;  %v571_v63 = vld [vmem:[#allocation2 + $0x34] sm:$0x1] }
  0xc9   : > { %v2892_v40 = vcombine.low %v1212_v10, %v1226_v16  ;;  %v639_v29 = vrot.slane %v637_v28, 5  ;;  %v896_v30 = vor.u32 %v895_v22, %v892_v21  ;;  %v648_v42 = vshrl.u32 %v568_v47, 16  ;;  %v867_v21 = vld [vmem:[#allocation2 + $0x28] sm:$0xf]  ;;  %v868_v22 = vld [vmem:[#allocation2 + $0x2c] sm:$0x1] }
  0xca   : > { %v645_v41 = vrot.slane %v643_v19, 5  ;;  %v651_v60 = vshll.u32 %v568_v47, 16  ;;  %v888_v33 = vsel %vm3358_vm15, %v883_v52, %v887_v17  ;;  %v657_v35 = vshll.u32 %v569_v24, 16 }
  0xcb   : > { %1297 = vrot.lane.b32.xlu1 %v2892_v40, %s3128_s18  ;;  %v640_v34 = vor.u32 %v639_v29, %v636_v53  ;;  %v1172_v61 = vshrl.u32 %v1155_v38, 16  ;;  %v897_v39 = vrot.slane %v896_v30, 4  ;;  %v650_v20 = vrot.slane %v648_v42, 4  ;;  %v3092_v53 = vld [vmem:[%s3866_s1 + $0x8] sm:$0xff]  }
  0xcc   : > { %v653_v44 = vrot.slane %v651_v60, 5  ;;  %v1175_v45 = vshll.u32 %v1155_v38, 16  ;;  %v659_v48 = vrot.slane %v657_v35, 5  ;;  %v1181_v51 = vshll.u32 %v1156_v31, 16  ;;  %v870_v31 = vld [vmem:[#allocation2 + $0x34] sm:$0x1]  ;;  %3024 = vmatprep.subr.bf16.mxu0 %v3092_v53 }
  0xcd   : > { %v641_v46 = vrot.slane %v640_v34, 4  ;;  %v1174_v50 = vrot.slane %v1172_v61, 4  ;;  %v902_v55 = vsel %vm3358_vm15, %v897_v39, %v901_v56  ;;  %v1186_v59 = vshrl.u32 %v1157_v54, 16  ;;  %v869_v56 = vld [vmem:[#allocation2 + $0x30] sm:$0xf]  ;;  %3025 = vmatpush3.bf16.msra.mxu0 %v3092_v53 }
  0xce   : > { %v654_v58 = vor.u32 %v653_v44, %v650_v20  ;;  %v1177_v25 = vrot.slane %v1175_v45, 5  ;;  %v2871_v0 = vcombine.low %v888_v33, %v902_v55  ;;  %v1183_v4 = vrot.slane %v1181_v51, 5  ;;  %v871_v61 = vld [vmem:[#allocation2 + $0x38] sm:$0xf] }
  0xcf   : > { %v646_v3 = vsel %vm3358_vm15, %v641_v46, %v645_v41  ;;  %v1189_v5 = vshll.u32 %v1157_v54, 16  ;;  %v1188_v9 = vrot.slane %v1186_v59, 4  ;;  %v1195_v10 = vshll.u32 %v1158_v49, 16  ;;  %v872_v46 = vld [vmem:[#allocation2 + $0x3c] sm:$0x1] }
  0xd0   : > { %v655_v26 = vrot.slane %v654_v58, 4  ;;  %v1178_v8 = vor.u32 %v1177_v25, %v1174_v50  ;;  %999 = vrot.lane.b32.xlu0 %v2871_v0, %s3127_s15  ;;  %v662_v14 = vshrl.u32 %v570_v62, 16  ;;  %v665_v15 = vshll.u32 %v570_v62, 16  ;;  %v874_v58 = vld [vmem:[#allocation2 + $0x44] sm:$0x1] }
  0xd1   : > { %v1191_v11 = vrot.slane %v1189_v5, 5  ;;  %v671_v17 = vshll.u32 %v571_v63, 16  ;;  %v1197_v47 = vrot.slane %v1195_v10, 5  ;;  %v676_v18 = vshrl.u32 %v572_v6, 16  ;;  %v1163_v0 = vld [vmem:[#allocation2 + $0x30] sm:$0xf] }
  0xd2   : > { %v660_v36 = vsel %vm3358_vm15, %v655_v26, %v659_v48  ;;  %v1179_v12 = vrot.slane %v1178_v8, 4  ;;  %v664_v28 = vrot.slane %v662_v14, 4  ;;  %v667_v16 = vrot.slane %v665_v15, 5  ;;  %v873_v48 = vld [vmem:[#allocation2 + $0x40] sm:$0xf] }
  0xd3   : > { %v2853_v24 = vcombine.low %v646_v3, %v660_v36  ;;  %v1192_v27 = vor.u32 %v1191_v11, %v1188_v9  ;;  %v678_v38 = vrot.slane %v676_v18, 4  ;;  %v679_v40 = vshll.u32 %v572_v6, 16  ;;  %v1165_v26 = vld [vmem:[#allocation2 + $0x38] sm:$0xf]  ;;  %v1164_v14 = vld [vmem:[#allocation2 + $0x34] sm:$0x1] }
  0xd4   : > { %v1184_v19 = vsel %vm3358_vm15, %v1179_v12, %v1183_v4  ;;  %v3466_v52 = vrot.slane %v1279_v23, 5  ;;  %v668_v30 = vor.u32 %v667_v16, %v664_v28  ;;  %v685_v41 = vshll.u32 %v573_v13, 16  ;;  %v3087_v8 = vld [vmem:[#allocation2 + $0x10] ss:$8 sps:$4 sm:$0xff]   ;;  %v1167_v28 = vld [vmem:[#allocation2 + $0x40] sm:$0xf] }
  0xd5   : > { %705 = vrot.lane.b32.xlu1 %v2853_v24, %s3126_s14  ;;  %v1193_v29 = vrot.slane %v1192_v27, 4  ;;  %v932_v42 = vshrl.u32 %v867_v21, 16  ;;  %v681_v60 = vrot.slane %v679_v40, 5  ;;  %v935_v32 = vshll.u32 %v867_v21, 16  ;;  %555 = vst.msk [vmem:[#allocation4 + $0x8] sm:$0xff] %vm553_vm0, %v3087_v8 }
  0xd6   : > { %v941_v33 = vshll.u32 %v868_v22, 16  ;;  %v946_v34 = vshrl.u32 %v869_v56, 16  ;;  %v669_v23 = vrot.slane %v668_v30, 4  ;;  %v673_v35 = vrot.slane %v671_v17, 5  ;;  %v1166_v27 = vld [vmem:[#allocation2 + $0x3c] sm:$0x1] }
  0xd7   : > { %v1198_v7 = vsel %vm3358_vm15, %v1193_v29, %v1197_v47  ;;  %v934_v54 = vrot.slane %v932_v42, 4  ;;  %v682_v20 = vor.u32 %v681_v60, %v678_v38  ;;  %v687_v44 = vrot.slane %v685_v41, 5  ;;  %v3088_v47 = vld [vmem:[#allocation2] ss:$8 sps:$4 sm:$0xff]   ;;  %v1168_v40 = vld [vmem:[#allocation2 + $0x44] sm:$0x1] }
  0xd8   : > { %v2891_v39 = vcombine.low %v1184_v19, %v1198_v7  ;;  %v937_v45 = vrot.slane %v935_v32, 5  ;;  %v943_v49 = vrot.slane %v941_v33, 5  ;;  %v948_v50 = vrot.slane %v946_v34, 4  ;;  %v3089_v16 = vld [vmem:[#allocation2 + $0x20] ss:$8 sps:$4 sm:$0xff]   ;;  %554 = vst.msk [vmem:[#allocation4] sm:$0xff] %vm553_vm0, %v3088_v47 }
  0xd9   : > { %v949_v51 = vshll.u32 %v869_v56, 16  ;;  %v955_v55 = vshll.u32 %v870_v31, 16  ;;  %v683_v25 = vrot.slane %v682_v20, 4  ;;  %v960_v62 = vshrl.u32 %v871_v61, 16  ;;  %556 = vst.msk [vmem:[#allocation4 + $0x10] sm:$0xff] %vm553_vm0, %v3089_v16 }
  0xda   : > { %1295 = vrot.lane.b32.xlu0 %v2891_v39, %s3128_s18  ;;  %v938_v59 = vor.u32 %v937_v45, %v934_v54  ;;  %v963_v63 = vshll.u32 %v871_v61, 16  ;;  %v674_v3 = vsel %vm3358_vm15, %v669_v23, %v673_v35  ;;  %v969_v5 = vshll.u32 %v872_v46, 16  ;;  %v3091_v33 = vld [vmem:[#allocation2 + $0x30] ss:$8 sps:$4 sm:$0xff]  }
  0xdb   : > { %v951_v4 = vrot.slane %v949_v51, 5  ;;  %v974_v6 = vshrl.u32 %v873_v48, 16  ;;  %v688_v9 = vsel %vm3358_vm15, %v683_v25, %v687_v44  ;;  %v962_v11 = vrot.slane %v960_v62, 4  ;;  %557 = vst.msk [vmem:[#allocation4 + $0x18] sm:$0xff] %vm553_vm0, %v3091_v33  ;;  %v1326_v51 = vld [vmem:[#allocation2 + $0x48] sm:$0xe] }
  0xdc   : > { %v939_v10 = vrot.slane %v938_v59, 4  ;;  %v965_v13 = vrot.slane %v963_v63, 5  ;;  %v2854_v15 = vcombine.low %v674_v3, %v688_v9  ;;  %v957_v36 = vrot.slane %v955_v55, 5  ;;  %v1327_v55 = vld [vmem:[#allocation2 + $0x4c] sm:$0x1] }
  0xdd   : > { %v952_v17 = vor.u32 %v951_v4, %v948_v50  ;;  %v976_v12 = vrot.slane %v974_v6, 4  ;;  %v977_v21 = vshll.u32 %v873_v48, 16  ;;  %v983_v24 = vshll.u32 %v874_v58, 16  ;;  %v1322_v62 = vld [vmem:[#allocation2 + $0x38] sm:$0xe] }
  0xde   : > { %v966_v18 = vor.u32 %v965_v13, %v962_v11  ;;  %707 = vrot.lane.b32.xlu1 %v2854_v15, %s3126_s14  ;;  %v944_v22 = vsel %vm3358_vm15, %v939_v10, %v943_v49  ;;  %v1228_v19 = vshrl.u32 %v1163_v0, 16  ;;  %v1231_v38 = vshll.u32 %v1163_v0, 16  ;;  %v1323_v63 = vld [vmem:[#allocation2 + $0x3c] sm:$0x1]  ;;  %v1324_v6 = vld [vmem:[#allocation2 + $0x40] sm:$0xe] }
  0xdf   : > { %v953_v56 = vrot.slane %v952_v17, 4  ;;  %v971_v29 = vrot.slane %v969_v5, 5  ;;  %v979_v30 = vrot.slane %v977_v21, 5  ;;  %v1242_v41 = vshrl.u32 %v1165_v26, 16  ;;  %v1320_v10 = vld [vmem:[#allocation2 + $0x30] sm:$0xe] }
  0xe0   : > { %v967_v53 = vrot.slane %v966_v18, 4  ;;  %v1230_v60 = vrot.slane %v1228_v19, 4  ;;  %v1233_v31 = vrot.slane %v1231_v38, 5  ;;  %v1237_v32 = vshll.u32 %v1164_v14, 16  ;;  %v1321_v11 = vld [vmem:[#allocation2 + $0x34] sm:$0x1] }
  0xe1   : > { %v958_v42 = vsel %vm3358_vm15, %v953_v56, %v957_v36  ;;  %v980_v7 = vor.u32 %v979_v30, %v976_v12  ;;  %v985_v23 = vrot.slane %v983_v24, 5  ;;  %v1244_v35 = vrot.slane %v1242_v41, 4  ;;  %v3093_v24 = vld [vmem:[%s3866_s1 + $0x10] ss:$0 sps:$4 sm:$0x33]  }
  0xe2   : > { %v2873_v34 = vcombine.low %v944_v22, %v958_v42  ;;  %v1234_v54 = vor.u32 %v1233_v31, %v1230_v60  ;;  %v1245_v61 = vshll.u32 %v1165_v26, 16  ;;  %v1251_v39 = vshll.u32 %v1166_v27, 16  ;;  %v1325_v26 = vld [vmem:[#allocation2 + $0x44] sm:$0x1]  ;;  %3054 = vmatprep.subr.msk.bf16.mxu0 %vm1442_vm1, %v3093_v24 }
  0xe3   : > { %v1256_v20 = vshrl.u32 %v1167_v28, 16  ;;  %v972_v44 = vsel %vm3358_vm15, %v967_v53, %v971_v29  ;;  %v981_v45 = vrot.slane %v980_v7, 4  ;;  %v1259_v46 = vshll.u32 %v1167_v28, 16 }
  0xe4   : > { %1003 = vrot.lane.b32.xlu0 %v2873_v34, %s3127_s15  ;;  %v1265_v48 = vshll.u32 %v1168_v40, 16  ;;  %v1247_v49 = vrot.slane %v1245_v61, 5  ;;  %v1239_v25 = vrot.slane %v1237_v32, 5  ;;  %v1235_v3 = vrot.slane %v1234_v54, 4 }
  0xe5   : > { %v1258_v50 = vrot.slane %v1256_v20, 4  ;;  %v986_v58 = vsel %vm3358_vm15, %v981_v45, %v985_v23  ;;  %v1261_v59 = vrot.slane %v1259_v46, 5  ;;  %v1253_v5 = vrot.slane %v1251_v39, 5 }
  0xe6   : > { %v2874_v0 = vcombine.low %v972_v44, %v986_v58  ;;  %v1248_v4 = vor.u32 %v1247_v49, %v1244_v35  ;;  %v1267_v9 = vrot.slane %v1265_v48, 5  ;;  %v2902_v13 = vrot.slane %v1326_v51, 9 }
  0xe7   : > { %v1262_v8 = vor.u32 %v1261_v59, %v1258_v50  ;;  %v2900_v15 = vrot.slane %v1322_v62, 9  ;;  %v1366_v17 = vrot.slane %v1323_v63, 5  ;;  %v1374_v36 = vrot.slane %v1327_v55, 5 }
  0xe8   : > { %1005 = vrot.lane.b32.xlu1 %v2874_v0, %s3127_s15  ;;  %v1249_v14 = vrot.slane %v1248_v4, 4  ;;  %v1282_v47 = vsel %vm3358_vm15, %v3335_v37, %v3466_v52  ;;  %v2901_v18 = vrot.slane %v1324_v6, 9  ;;  %v1370_v21 = vrot.slane %v1325_v26, 5 }
  0xe9   : > { %v1263_v12 = vrot.slane %v1262_v8, 4  ;;  %v1240_v27 = vsel %vm3358_vm15, %v1235_v3, %v1239_v25  ;;  %v2899_v16 = vrot.slane %v1320_v10, 9  ;;  %v1362_v22 = vrot.slane %v1321_v11, 5 }
  0xea   : > { %v1254_v28 = vsel %vm3358_vm15, %v1249_v14, %v1253_v5  ;;  %v1367_v37 = vsel %vm3350_vm14, %v2900_v15, %v1366_v17  ;;  %v1371_v52 = vsel %vm3350_vm14, %v2901_v18, %v1370_v21  ;;  %v1375_v40 = vsel %vm3350_vm14, %v2902_v13, %v1374_v36  ;;  %v3558_v13 = vld [vmem:[%s3867_s2] ss:$0 sm:$0xff] }
  0xeb   : > { %v2893_v56 = vcombine.low %v1240_v27, %v1254_v28  ;;  %v1268_v19 = vsel %vm3358_vm15, %v1263_v12, %v1267_v9  ;;  %v1444_v53 = vsel %vm1442_vm1, %v3093_v24, 0  ;;  %v1363_v29 = vsel %vm3350_vm14, %v2899_v16, %v1362_v22  ;;  %v3563_v15 = vld [vmem:[%s3868_s3] ss:$0 sm:$0xff] }
  0xec   : > { %v2894_v38 = vcombine.low %v1268_v19, %v1282_v47  ;;  %3027 = vmatpush3.bf16.msra.mxu0 %v1444_v53  ;;  %v2905_v30 = vcombine.low %v1363_v29, %v1367_v37  ;;  %v2906_v41 = vcombine.low %v1371_v52, %v1375_v40  ;;  %vm2041_vm0 = vcmask 261312  }
  0xed   : > { %1299 = vrot.lane.b32.xlu0 %v2893_v56, %s3128_s18  ;;  %vm2291_vm1 = vcmask 392512  }
  0xee   : > { %1301 = vrot.lane.b32.xlu1 %v2894_v38, %s3128_s18 }
  0xf1   : > { %1392 = vrot.lane.b32.xlu0 %v2905_v30, %s3125_s13  ;;  %v1678_v30 = vld [vmem:[#allocation3 + $0x18] sm:$0xf] }
  0xf2   : > { %1394 = vrot.lane.b32.xlu1 %v2906_v41, %s3125_s13  ;;  %v1681_v41 = vld [vmem:[#allocation3 + $0x1c] sm:$0x1] }
 0x10f   : > { %v845_v42 = vpop.permute.xlu1 %844  ;;  %v843_v60 = vpop.permute.xlu0 %842 }
 0x113   : > { %v1139_v32 = vpop.permute.xlu0 %1138 }
 0x114   : > { %v1141_v31 = vpop.permute.xlu1 %1140 }
 0x117   : > { %v847_v34 = vpop.permute.xlu0 %846 }
 0x118   : > { %v849_v33 = vpop.permute.xlu1 %848 }
 0x11b   : > { %v1143_v23 = vpop.permute.xlu0 %1142 }
 0x11c   : > { %v1145_v7 = vpop.permute.xlu1 %1144 }
 0x11f   : > { %v798_v54 = vpop.permute.xlu0 %797 }
 0x120   : > { %v800_v35 = vpop.permute.xlu1 %799 }
 0x123   : > { %v1093_v39 = vpop.permute.xlu0 %1092 }
 0x124   : > { %v1095_v61 = vpop.permute.xlu1 %1094 }
 0x127   : > { %v1389_v44 = vpop.permute.xlu0 %1388 }
 0x128   : > { %v804_v20 = vpop.permute.xlu1 %803 }
 0x12b   : > { %v1391_v46 = vpop.permute.xlu0 %1390 }
 0x12c   : > { %v1099_v45 = vpop.permute.xlu1 %1098 }
 0x12f   : > { %v802_v49 = vpop.permute.xlu0 %801 }
 0x130   : > { %v704_v48 = vpop.permute.xlu1 %703 }
 0x131   : > { %715 = vst.msk [vmem:[#allocation4 + $0x8] sm:$0xff] %vm713_vm2, %v704_v48  ;;  %v1672_v48 = vld [vmem:[#allocation3 + $0x10] sm:$0xf] }
 0x132   : > { %811 = vst.msk [vmem:[#allocation4 + $0x8] sm:$0xff] %vm809_vm3, %v800_v35 }
 0x133   : > { %856 = vst.msk [vmem:[#allocation4 + $0x8] sm:$0xff] %vm854_vm4, %v845_v42  ;;  %v1097_v50 = vpop.permute.xlu0 %1096 }
 0x137   : > { %v1002_v51 = vpop.permute.xlu1 %1001 }
 0x138   : > { %1013 = vst.msk [vmem:[#allocation4 + $0x8] sm:$0xff] %vm1011_vm5, %v1002_v51  ;;  %v702_v55 = vpop.permute.xlu0 %701 }
 0x139   : > { %1106 = vst.msk [vmem:[#allocation4 + $0x8] sm:$0xff] %vm1104_vm8, %v1095_v61  ;;  %v1687_v61 = vld [vmem:[#allocation3 + $0x24] sm:$0x1] }
 0x13a   : > { %1152 = vst.msk [vmem:[#allocation4 + $0x8] sm:$0xff] %vm1150_vm9, %v1141_v31 }
 0x13b   : > { %714 = vst.msk [vmem:[#allocation4] sm:$0xff] %vm713_vm2, %v702_v55 }
 0x13c   : > { %810 = vst.msk [vmem:[#allocation4] sm:$0xff] %vm809_vm3, %v798_v54  ;;  %v1684_v54 = vld [vmem:[#allocation3 + $0x20] sm:$0xf] }
 0x13d   : > { %855 = vst.msk [vmem:[#allocation4] sm:$0xff] %vm854_vm4, %v843_v60  ;;  %v1298_v58 = vpop.permute.xlu1 %1297 }
 0x13e   : > { %1309 = vst.msk [vmem:[#allocation4 + $0x8] sm:$0xff] %vm1307_vm10, %v1298_v58  ;;  %v1751_v58 = vld [vmem:[#allocation3] sm:$0xf] }
 0x13f   : > { %1402 = vst.msk [vmem:[#allocation4 + $0x8] sm:$0xff] %vm1400_vm11, %v1391_v46 }
 0x142   : > { %v1000_v25 = vpop.permute.xlu0 %999 }
 0x143   : > { %1012 = vst.msk [vmem:[#allocation4] sm:$0xff] %vm1011_vm5, %v1000_v25 }
 0x144   : > { %1105 = vst.msk [vmem:[#allocation4] sm:$0xff] %vm1104_vm8, %v1093_v39 }
 0x145   : > { %1151 = vst.msk [vmem:[#allocation4] sm:$0xff] %vm1150_vm9, %v1139_v32 }
 0x146   : > { %v1406_v4 = vld [vmem:[#allocation4 + $0x8] sm:$0xff] }
 0x147   : > { %v706_v59 = vpop.permute.xlu1 %705 }
 0x148   : > { %716 = vst.msk [vmem:[#allocation4 + $0x10] sm:$0xff] %vm713_vm2, %v706_v59 }
 0x149   : > { %812 = vst.msk [vmem:[#allocation4 + $0x10] sm:$0xff] %vm809_vm3, %v802_v49 }
 0x14a   : > { %857 = vst.msk [vmem:[#allocation4 + $0x10] sm:$0xff] %vm854_vm4, %v847_v34  ;;  %v1669_v34 = vld [vmem:[#allocation3 + $0xc] sm:$0x1] }
 0x14c   : > { %v1296_v62 = vpop.permute.xlu0 %1295 }
 0x14d   : > { %1308 = vst.msk [vmem:[#allocation4] sm:$0xff] %vm1307_vm10, %v1296_v62 }
 0x14e   : > { %1401 = vst.msk [vmem:[#allocation4] sm:$0xff] %vm1400_vm11, %v1389_v44 }
 0x150   : > { %v708_v63 = vpop.permute.xlu1 %707 }
 0x151   : > { %717 = vst.msk [vmem:[#allocation4 + $0x18] sm:$0xff] %vm713_vm2, %v708_v63  ;;  %vm2337_vm2 = vcmask 458112  }
 0x152   : > { %813 = vst.msk [vmem:[#allocation4 + $0x18] sm:$0xff] %vm809_vm3, %v804_v20  ;;  %vm2494_vm3 = vcmask 523712  }
 0x153   : > { %858 = vst.msk [vmem:[#allocation4 + $0x18] sm:$0xff] %vm854_vm4, %v849_v33  ;;  %v1664_v33 = vld [vmem:[#allocation3 + $0x8] sm:$0xf]  ;;  %vm2587_vm4 = vcmask 589312  }
 0x155   : > { %v1405_v0 = vld [vmem:[#allocation4] sm:$0xff] }
 0x156   : > { %v1004_v3 = vpop.permute.xlu0 %1003  ;;  %3028 = vmatprep.mubr.msk.bf16.mxu0 %vm1429_vm12, %v1405_v0  ;;  %v1675_v0 = vld [vmem:[#allocation3 + $0x14] sm:$0x1] }
 0x157   : > { %1014 = vst.msk [vmem:[#allocation4 + $0x10] sm:$0xff] %vm1011_vm5, %v1004_v3  ;;  %3029 = vmatmul.mubr.msk.bf16.vlgmr.msra.gmra.mrb[0].mxu0 %vm1429_vm12, %v1406_v4  ;;  %v2356_v3 = vld [vmem:[#allocation3 + $0x48] sm:$0xf] }
 0x158   : > { %1107 = vst.msk [vmem:[#allocation4 + $0x10] sm:$0xff] %vm1104_vm8, %v1097_v50 }
 0x159   : > { %1153 = vst.msk [vmem:[#allocation4 + $0x10] sm:$0xff] %vm1150_vm9, %v1143_v23 }
 0x15a   : > { %v1006_v5 = vpop.permute.xlu1 %1005 }
 0x15b   : > { %1015 = vst.msk [vmem:[#allocation4 + $0x18] sm:$0xff] %vm1011_vm5, %v1006_v5  ;;  %vm2632_vm5 = vcmask 588800  }
 0x15c   : > { %1108 = vst.msk [vmem:[#allocation4 + $0x18] sm:$0xff] %vm1104_vm8, %v1099_v45  ;;  %vm2784_vm8 = vcmask 523264  }
 0x15d   : > { %1154 = vst.msk [vmem:[#allocation4 + $0x18] sm:$0xff] %vm1150_vm9, %v1145_v7 }
 0x15f   : > { %v1300_v6 = vpop.permute.xlu0 %1299 }
 0x160   : > { %v1302_v26 = vpop.permute.xlu1 %1301  ;;  %1310 = vst.msk [vmem:[#allocation4 + $0x10] sm:$0xff] %vm1307_vm10, %v1300_v6 }
 0x161   : > { %1311 = vst.msk [vmem:[#allocation4 + $0x18] sm:$0xff] %vm1307_vm10, %v1302_v26 }
 0x163   : > { %v1393_v8 = vpop.permute.xlu0 %1392 }
 0x164   : > { %v1395_v9 = vpop.permute.xlu1 %1394  ;;  %1403 = vst.msk [vmem:[#allocation4 + $0x10] sm:$0xff] %vm1400_vm11, %v1393_v8 }
 0x165   : > { %1404 = vst.msk [vmem:[#allocation4 + $0x18] sm:$0xff] %vm1400_vm11, %v1395_v9 }
 0x16b   : > { %v1407_v10 = vld [vmem:[#allocation4 + $0x10] sm:$0xff] }
 0x16c   : > { %3032 = vmatprep.mubr.msk.bf16.mxu0 %vm1429_vm12, %v1407_v10  ;;  %v1408_v11 = vld [vmem:[#allocation4 + $0x18] sm:$0xff]  ;;  %v1768_v10 = vshrl.u32 %v1751_v58, 16 }
 0x16d   : > { %3033 = vmatmul.mubr.msk.bf16.gmra.mrb[4].mxu0 %vm1429_vm12, %v1408_v11 }
 0x22a   : > { %v3030_v14 = vpop.f32.mrb[0].mxu0 }
 0x22b   : > { %v1520_v17 = vmul.f32 %v3030_v14, %v3558_v13  ;;  %v1480_v36 = vpop.f32.mrb[1].mxu0 }
 0x22c   : > { %v1518_v12 = vmul.f32 %v3558_v13, %v1480_v36  ;;  %v3031_v47 = vpop.f32.mrb[2].mxu0  ;;  %v1909_v36 = vld [vmem:[#allocation3 + $0x4] sm:$0x1] }
 0x22d   : > { %v1535_v18 = vadd.f32 %v3563_v15, %v1520_v17  ;;  %v1521_v21 = vmul.f32 %v3031_v47, %v3558_v13  ;;  %v1483_v24 = vpop.f32.mrb[3].mxu0  ;;  %v1908_v17 = vld [vmem:[#allocation3] sm:$0xe]  ;;  %v2457_v47 = vshrl.u32 %v2356_v3, 16 }
 0x22e   : > { %v1533_v27 = vadd.f32 %v3563_v15, %v1518_v12  ;;  %v1519_v28 = vmul.f32 %v3558_v13, %v1483_v24  ;;  %v1771_v12 = vshll.u32 %v1751_v58, 16  ;;  %v2932_v24 = vrot.slane %v1908_v17, 9 }
 0x22f   : > { %v1543_v16 = vmax.f32 %v1535_v18, 0.0  ;;  %v1536_v22 = vadd.f32 %v3563_v15, %v1521_v21  ;;  %v1752_v18 = vld [vmem:[#allocation3 + $0x4] sm:$0x1]  ;;  %v2460_v21 = vshll.u32 %v2356_v3, 16 }
 0x230   : > { %v1541_v56 = vmax.f32 %v1533_v27, 0.0  ;;  %v1534_v19 = vadd.f32 %v3563_v15, %v1519_v28  ;;  %v1942_v27 = vrot.slane %v1909_v36, 5  ;;  %v3589_v28 = vrot.slane %v1768_v10, 4 }
 0x231   : > { %v3000_v38 = vpack.c.bf16 %v1543_v16, %v1543_v16  ;;  %v1544_v37 = vmax.f32 %v1536_v22, 0.0  ;;  %v3591_v16 = vrot.slane %v1771_v12, 5  ;;  %v1777_v22 = vshll.u32 %v1752_v18, 16  ;;  %v1702_v12 = vld [vmem:[#allocation3 + $0x38] sm:$0xf] }
 0x232   : > { %v2998_v52 = vpack.c.bf16 %v1541_v56, %v1541_v56  ;;  %v1542_v40 = vmax.f32 %v1534_v19, 0.0  ;;  %v3593_v56 = vrot.slane %v2457_v47, 4  ;;  %v1705_v47 = vld [vmem:[#allocation3 + $0x3c] sm:$0x1] }
 0x233   : > { %v1598_v53 = vshrl.u32 %v3000_v38, 16  ;;  %v3001_v29 = vpack.c.bf16 %v1544_v37, %v1544_v37  ;;  %v1601_v32 = vshll.u32 %v3000_v38, 16  ;;  %v3595_v37 = vrot.slane %v2460_v21, 5 }
 0x234   : > { %v1582_v42 = vshrl.u32 %v2998_v52, 16  ;;  %v2999_v60 = vpack.c.bf16 %v1542_v40, %v1542_v40  ;;  %v1585_v35 = vshll.u32 %v2998_v52, 16 }
 0x235   : > { %v1600_v31 = vrot.slane %v1598_v53, 7  ;;  %v1606_v7 = vshrl.u32 %v3001_v29, 16  ;;  %v1609_v46 = vshll.u32 %v3001_v29, 16 }
 0x236   : > { %v1584_v23 = vrot.slane %v1582_v42, 7  ;;  %v1590_v39 = vshrl.u32 %v2999_v60, 16  ;;  %v1593_v55 = vshll.u32 %v2999_v60, 16 }
 0x237   : > { %v1603_v20 = vor.u32 %v1601_v32, %v1600_v31  ;;  %v1604_v44 = vrot.slane %v1600_v31, 4  ;;  %v1608_v45 = vrot.slane %v1606_v7, 7 }
 0x238   : > { %v1587_v49 = vor.u32 %v1585_v35, %v1584_v23  ;;  %v1588_v50 = vrot.slane %v1584_v23, 4  ;;  %v1592_v51 = vrot.slane %v1590_v39, 7  ;;  %v3605_v23 = vsel %vm3350_vm14, %v2932_v24, %v1942_v27 }
 0x239   : > { %v1679_v25 = vsel %vm3236_vm6, %v1603_v20, %v1678_v30  ;;  %v1682_v59 = vsel %vm3245_vm7, %v1604_v44, %v1681_v41  ;;  %v1611_v62 = vor.u32 %v1609_v46, %v1608_v45  ;;  %v1612_v63 = vrot.slane %v1608_v45, 4  ;;  %v3598_v30 = vld [vmem:[#allocation3 + $0x4c] sm:$0x1] }
 0x23a   : > { %1680 = vst [vmem:[#allocation3 + $0x18] sm:$0xf] %v1679_v25  ;;  %1683 = vst [vmem:[#allocation3 + $0x1c] sm:$0x1] %v1682_v59  ;;  %v1665_v4 = vsel %vm3236_vm6, %v1587_v49, %v1664_v33  ;;  %v1670_v5 = vsel %vm3245_vm7, %v1588_v50, %v1669_v34  ;;  %v1595_v6 = vor.u32 %v1593_v55, %v1592_v51  ;;  %v1596_v26 = vrot.slane %v1592_v51, 4 }
 0x23b   : > { %1666 = vst [vmem:[#allocation3 + $0x8] sm:$0xf] %v1665_v4  ;;  %1671 = vst [vmem:[#allocation3 + $0xc] sm:$0x1] %v1670_v5  ;;  %v1685_v8 = vsel %vm3236_vm6, %v1611_v62, %v1684_v54  ;;  %v1688_v9 = vsel %vm3245_vm7, %v1612_v63, %v1687_v61  ;;  %v3607_v35 = vrot.slane %v1777_v22, 5  ;;  %v1774_v44 = vor.u32 %v3591_v16, %v3589_v28 }
 0x23c   : > { %1686 = vst [vmem:[#allocation3 + $0x20] sm:$0xf] %v1685_v8  ;;  %1689 = vst [vmem:[#allocation3 + $0x24] sm:$0x1] %v1688_v9  ;;  %v1673_v11 = vsel %vm3236_vm6, %v1595_v6, %v1672_v48  ;;  %v1676_v14 = vsel %vm3245_vm7, %v1596_v26, %v1675_v0  ;;  %v2463_v45 = vor.u32 %v3595_v37, %v3593_v56  ;;  %v2466_v59 = vshll.u32 %v3598_v30, 16 }
 0x23d   : > { %1674 = vst [vmem:[#allocation3 + $0x10] sm:$0xf] %v1673_v11  ;;  %1677 = vst [vmem:[#allocation3 + $0x14] sm:$0x1] %v1676_v14 }
 0x240   : > { %v3034_v19 = vpop.f32.mrb[4].mxu0 }
 0x241   : > { %v2207_v38 = vld [vmem:[#allocation3 + $0x18] sm:$0xe]  ;;  %v1524_v52 = vmul.f32 %v3034_v19, %v3558_v13  ;;  %v1496_v40 = vpop.f32.mrb[5].mxu0  ;;  %v2208_v53 = vld [vmem:[#allocation3 + $0x1c] sm:$0x1] }
 0x242   : > { %v2954_v29 = vrot.slane %v2207_v38, 9  ;;  %v1522_v41 = vmul.f32 %v3558_v13, %v1496_v40  ;;  %v3035_v42 = vpop.f32.mrb[6].mxu0  ;;  %v2245_v31 = vrot.slane %v2208_v53, 5  ;;  %v1914_v4 = vld [vmem:[#allocation3 + $0x18] sm:$0xe] }
 0x243   : > { %v3094_v60 = vld [vmem:[#allocation3 + $0x18] ss:$8 sps:$4 sm:$0xff]   ;;  %v1539_v32 = vadd.f32 %v3563_v15, %v1524_v52  ;;  %v1525_v33 = vmul.f32 %v3035_v42, %v3558_v13  ;;  %v1499_v34 = vpop.f32.mrb[7].mxu0  ;;  %v2210_v20 = vld [vmem:[#allocation3 + $0x24] sm:$0x1]  ;;  %v2935_v17 = vrot.slane %v1914_v4, 9 }
 0x244   : > { %v3095_v7 = vld [vmem:[#allocation3 + $0x8] ss:$8 sps:$4 sm:$0xff]   ;;  %v1537_v54 = vadd.f32 %v3563_v15, %v1522_v41  ;;  %v1523_v61 = vmul.f32 %v3558_v13, %v1499_v34  ;;  %2031 = vrot.lane.b32.xlu1 %v3094_v60, %s3122_s10  ;;  %v2209_v39 = vld [vmem:[#allocation3 + $0x20] sm:$0xe]  ;;  %v2249_v50 = vrot.slane %v2210_v20, 5  ;;  %v2246_v55 = vsel %vm3350_vm14, %v2954_v29, %v2245_v31 }
 0x245   : > { %v1547_v46 = vmax.f32 %v1539_v32, 0.0  ;;  %v1540_v48 = vadd.f32 %v3563_v15, %v1525_v33  ;;  %2029 = vrot.lane.b32.xlu0 %v3095_v7, %s3122_s10  ;;  %v2955_v49 = vrot.slane %v2209_v39, 9  ;;  %v3096_v58 = vld [vmem:[#allocation3 + $0x10] ss:$8 sps:$4 sm:$0xff]   ;;  %v1913_v3 = vld [vmem:[#allocation3 + $0x14] sm:$0x1] }
 0x246   : > { %v1545_v51 = vmax.f32 %v1537_v54, 0.0  ;;  %v1538_v13 = vadd.f32 %v3563_v15, %v1523_v61  ;;  %v1912_v25 = vld [vmem:[#allocation3 + $0x10] sm:$0xe]  ;;  %v1915_v9 = vld [vmem:[#allocation3 + $0x1c] sm:$0x1]  ;;  %v1950_v15 = vrot.slane %v1913_v3, 5 }
 0x247   : > { %v3004_v62 = vpack.c.bf16 %v1547_v46, %v1547_v46  ;;  %v1548_v63 = vmax.f32 %v1540_v48, 0.0  ;;  %v2250_v0 = vsel %vm3350_vm14, %v2955_v49, %v2249_v50  ;;  %v2934_v5 = vrot.slane %v1912_v25, 9  ;;  %v3625_v36 = vld [vmem:[#allocation3 + $0x8] sm:$0xe]  ;;  %v1693_v38 = vld [vmem:[#allocation3 + $0x2c] sm:$0x1] }
 0x248   : > { %v3002_v6 = vpack.c.bf16 %v1545_v51, %v1545_v51  ;;  %v1546_v26 = vmax.f32 %v1538_v13, 0.0  ;;  %v2961_v8 = vcombine.low %v2246_v55, %v2250_v0  ;;  %v1690_v19 = vld [vmem:[#allocation3 + $0x28] sm:$0xf]  ;;  %v1954_v53 = vrot.slane %v1915_v9, 5  ;;  %v1708_v41 = vld [vmem:[#allocation3 + $0x40] sm:$0xf] }
 0x249   : > { %v1630_v10 = vshrl.u32 %v3004_v62, 16  ;;  %v1633_v11 = vshll.u32 %v3004_v62, 16  ;;  %v3005_v14 = vpack.c.bf16 %v1548_v63, %v1548_v63  ;;  %2325 = vrot.lane.b32.xlu0 %v3096_v58, %s3129_s29  ;;  %v1951_v27 = vsel %vm3350_vm14, %v2934_v5, %v1950_v15  ;;  %v1711_v42 = vld [vmem:[#allocation3 + $0x44] sm:$0x1]  ;;  %v1696_v54 = vld [vmem:[#allocation3 + $0x30] sm:$0xf] }
 0x24a   : > { %v1614_v18 = vshrl.u32 %v3002_v6, 16  ;;  %v1617_v21 = vshll.u32 %v3002_v6, 16  ;;  %v3003_v24 = vpack.c.bf16 %v1546_v26, %v1546_v26  ;;  %2281 = vrot.lane.b32.xlu1 %v2961_v8, %s3130_s30  ;;  %v2933_v32 = vrot.slane %v3625_v36, 9  ;;  %v1699_v61 = vld [vmem:[#allocation3 + $0x34] sm:$0x1] }
 0x24b   : > { %v1632_v22 = vrot.slane %v1630_v10, 7  ;;  %v1638_v52 = vshrl.u32 %v3005_v14, 16  ;;  %v1641_v40 = vshll.u32 %v3005_v14, 16  ;;  %v1955_v39 = vsel %vm3350_vm14, %v2935_v17, %v1954_v53  ;;  %v1911_v50 = vld [vmem:[#allocation3 + $0xc] sm:$0x1] }
 0x24c   : > { %v1616_v29 = vrot.slane %v1614_v18, 7  ;;  %v1622_v60 = vshrl.u32 %v3003_v24, 16  ;;  %v1625_v31 = vshll.u32 %v3003_v24, 16  ;;  %v2941_v49 = vcombine.low %v1951_v27, %v1955_v39  ;;  %v2203_v51 = vld [vmem:[#allocation3 + $0x8] sm:$0xe] }
 0x24d   : > { %v1635_v33 = vor.u32 %v1633_v11, %v1632_v22  ;;  %v1636_v34 = vrot.slane %v1632_v22, 4  ;;  %v1640_v7 = vrot.slane %v1638_v52, 7  ;;  %v2204_v62 = vld [vmem:[#allocation3 + $0xc] sm:$0x1]  ;;  %v2205_v63 = vld [vmem:[#allocation3 + $0x10] sm:$0xe] }
 0x24e   : > { %v1619_v20 = vor.u32 %v1617_v21, %v1616_v29  ;;  %v1620_v46 = vrot.slane %v1616_v29, 4  ;;  %v1624_v48 = vrot.slane %v1622_v60, 7  ;;  %1986 = vrot.lane.b32.xlu1 %v2941_v49, %s3127_s15  ;;  %v2206_v6 = vld [vmem:[#allocation3 + $0x14] sm:$0x1]  ;;  %v1946_v9 = vrot.slane %v1911_v50, 5 }
 0x24f   : > { %v1703_v13 = vsel %vm3236_vm6, %v1635_v33, %v1702_v12  ;;  %v1706_v55 = vsel %vm3245_vm7, %v1636_v34, %v1705_v47  ;;  %v1643_v58 = vor.u32 %v1641_v40, %v1640_v7  ;;  %v1644_v25 = vrot.slane %v1640_v7, 4  ;;  %v2499_v10 = vld [vmem:[#allocation3 + $0x10] sm:$0xe]  ;;  %v2500_v11 = vld [vmem:[#allocation3 + $0x14] sm:$0x1] }
 0x250   : > { %1704 = vst [vmem:[#allocation3 + $0x38] sm:$0xf] %v1703_v13  ;;  %1707 = vst [vmem:[#allocation3 + $0x3c] sm:$0x1] %v1706_v55  ;;  %v1691_v0 = vsel %vm3236_vm6, %v1619_v20, %v1690_v19  ;;  %v1694_v3 = vsel %vm3245_vm7, %v1620_v46, %v1693_v38  ;;  %v1627_v4 = vor.u32 %v1625_v31, %v1624_v48  ;;  %v1628_v5 = vrot.slane %v1624_v48, 4 }
 0x251   : > { %1692 = vst [vmem:[#allocation3 + $0x28] sm:$0xf] %v1691_v0  ;;  %1695 = vst [vmem:[#allocation3 + $0x2c] sm:$0x1] %v1694_v3  ;;  %v1709_v26 = vsel %vm3236_vm6, %v1643_v58, %v1708_v41  ;;  %v1712_v8 = vsel %vm3245_vm7, %v1644_v25, %v1711_v42  ;;  %v2952_v15 = vrot.slane %v2203_v51, 9  ;;  %v2237_v36 = vrot.slane %v2204_v62, 5 }
 0x252   : > { %1710 = vst [vmem:[#allocation3 + $0x40] sm:$0xf] %v1709_v26  ;;  %1713 = vst [vmem:[#allocation3 + $0x44] sm:$0x1] %v1712_v8  ;;  %v1697_v14 = vsel %vm3236_vm6, %v1627_v4, %v1696_v54  ;;  %v1700_v17 = vsel %vm3245_vm7, %v1628_v5, %v1699_v61  ;;  %v2953_v12 = vrot.slane %v2205_v63, 9  ;;  %v1947_v21 = vsel %vm3350_vm14, %v2933_v32, %v1946_v9 }
 0x253   : > { %v2501_v47 = vld [vmem:[#allocation3 + $0x18] sm:$0xe]  ;;  %v1753_v18 = vld [vmem:[#allocation3 + $0x8] sm:$0xf]  ;;  %1698 = vst [vmem:[#allocation3 + $0x30] sm:$0xf] %v1697_v14  ;;  %v2940_v2 = vcombine.low %v3605_v23, %v1947_v21  ;;  %v2238_v56 = vsel %vm3350_vm14, %v2952_v15, %v2237_v36 }
 0x254   : > { %1701 = vst [vmem:[#allocation3 + $0x34] sm:$0x1] %v1700_v17  ;;  %v2241_v24 = vrot.slane %v2206_v6, 5  ;;  %v1754_v27 = vld [vmem:[#allocation3 + $0xc] sm:$0x1]  ;;  %v3655_v22 = vrot.slane %v1774_v44, 4 }
 0x255   : > { %v2050_v1 = vld [vmem:[#allocation3 + $0x18] sm:$0xf]  ;;  %v3657_v19 = vld [vmem:[#allocation3 + $0x48] sm:$0xe]  ;;  %v2502_v38 = vld [vmem:[#allocation3 + $0x1c] sm:$0x1]  ;;  %1984 = vrot.lane.b32.xlu0 %v2940_v2, %s3127_s15 }
 0x256   : > { %v2972_v52 = vrot.slane %v2499_v10, 9  ;;  %v3663_v40 = vrot.slane %v2463_v45, 4  ;;  %v3667_v53 = vrot.slane %v2466_v59, 5  ;;  %v3669_v29 = vld [vmem:[#allocation3 + $0x4c] sm:$0x1]  ;;  %v2242_v28 = vsel %vm3350_vm14, %v2953_v12, %v2241_v24 }
 0x257   : > { %v2533_v16 = vrot.slane %v2500_v11, 5  ;;  %v1782_v44 = vshrl.u32 %v1753_v18, 16  ;;  %v1785_v41 = vshll.u32 %v1753_v18, 16  ;;  %v2051_v23 = vld [vmem:[#allocation3 + $0x1c] sm:$0x1]  ;;  %v2973_v37 = vrot.slane %v2501_v47, 9 }
 0x258   : > { %v2052_v42 = vld [vmem:[#allocation3 + $0x20] sm:$0xf]  ;;  %v1791_v45 = vshll.u32 %v1754_v27, 16  ;;  %v2053_v30 = vld [vmem:[#allocation3 + $0x24] sm:$0x1]  ;;  %v2091_v59 = vshrl.u32 %v2050_v1, 16  ;;  %v2960_v7 = vcombine.low %v2238_v56, %v2242_v28  ;;  %v1780_v63 = vsel %vm3358_vm15, %v3655_v22, %v3607_v35 }
 0x259   : > { %v2537_v60 = vrot.slane %v2502_v38, 5  ;;  %v1784_v31 = vrot.slane %v1782_v44, 4  ;;  %v1787_v32 = vrot.slane %v1785_v41, 5  ;;  %v2094_v33 = vshll.u32 %v2050_v1, 16  ;;  %v3097_v34 = vld [vmem:[#allocation3 + $0x20] ss:$8 sps:$4 sm:$0xff]  }
 0x25a   : > { %v2093_v54 = vrot.slane %v2091_v59, 4  ;;  %v1755_v61 = vld [vmem:[#allocation3 + $0x10] sm:$0xf]  ;;  %v2979_v39 = vrot.slane %v3657_v19, 9  ;;  %v2534_v20 = vsel %vm3350_vm14, %v2972_v52, %v2533_v16  ;;  %v1793_v48 = vrot.slane %v1791_v45, 5  ;;  %2327 = vrot.lane.b32.xlu1 %v3097_v34, %s3129_s29  ;;  %2279 = vrot.lane.b32.xlu0 %v2960_v7, %s3130_s30 }
 0x25b   : > { %v1788_v46 = vor.u32 %v1787_v32, %v1784_v31  ;;  %v1756_v49 = vld [vmem:[#allocation3 + $0x14] sm:$0x1]  ;;  %v2561_v50 = vrot.slane %v3669_v29, 5  ;;  %v2096_v51 = vrot.slane %v2094_v33, 5  ;;  %v2100_v13 = vshll.u32 %v2051_v23, 16 }
 0x25c   : > { %v2105_v55 = vshrl.u32 %v2052_v42, 16  ;;  %v2108_v58 = vshll.u32 %v2052_v42, 16  ;;  %v1757_v25 = vld [vmem:[#allocation3 + $0x18] sm:$0xf]  ;;  %v2538_v62 = vsel %vm3350_vm14, %v2973_v37, %v2537_v60  ;;  %v2114_v3 = vshll.u32 %v2053_v30, 16  ;;  %v3104_v41 = vld [vmem:[%s3869_s4] sm:$0xff]  }
 0x25d   : > { %v1789_v0 = vrot.slane %v1788_v46, 4  ;;  %v3098_v4 = vld [vmem:[#allocation3 + $0x38] ss:$8 sps:$4 sm:$0xff]   ;;  %v2980_v5 = vcombine.low %v2534_v20, %v2538_v62  ;;  %v2097_v6 = vor.u32 %v2096_v51, %v2093_v54  ;;  %v1758_v9 = vld [vmem:[#allocation3 + $0x1c] sm:$0x1]  ;;  %v2102_v10 = vrot.slane %v2100_v13, 5  ;;  %3036 = vmatprep.subr.bf16.mxu1 %v3104_v41 }
 0x25e   : > { %v2107_v26 = vrot.slane %v2105_v55, 4  ;;  %v2110_v8 = vrot.slane %v2108_v58, 5  ;;  %v1796_v11 = vshrl.u32 %v1755_v61, 16  ;;  %v1799_v14 = vshll.u32 %v1755_v61, 16  ;;  %2035 = vrot.lane.b32.xlu1 %v3098_v4, %s3122_s10  ;;  %v3099_v35 = vld [vmem:[#allocation3 + $0x40] ss:$8 sps:$4 sm:$0xff]   ;;  %3037 = vmatpush3.bf16.msra.mxu1 %v3104_v41 }
 0x25f   : > { %v1794_v15 = vsel %vm3358_vm15, %v1789_v0, %v1793_v48  ;;  %2575 = vrot.lane.b32.xlu0 %v2980_v5, %s3131_s8  ;;  %v2098_v17 = vrot.slane %v2097_v6, 4  ;;  %v2116_v12 = vrot.slane %v2114_v3, 5  ;;  %v1805_v47 = vshll.u32 %v1756_v49, 16  ;;  %v2215_v22 = vld [vmem:[#allocation3 + $0x38] sm:$0xe] }
 0x260   : > { %v2111_v36 = vor.u32 %v2110_v8, %v2107_v26  ;;  %v1798_v18 = vrot.slane %v1796_v11, 4  ;;  %v1801_v21 = vrot.slane %v1799_v14, 5  ;;  %v1810_v24 = vshrl.u32 %v1757_v25, 16  ;;  %v2046_v1 = vld [vmem:[#allocation3 + $0x8] sm:$0xf]  ;;  %v3105_v4 = vld [vmem:[%s3869_s4 + $0x8] sm:$0xff]  }
 0x261   : > { %v1813_v27 = vshll.u32 %v1757_v25, 16  ;;  %v2928_v2 = vcombine.low %v1780_v63, %v1794_v15  ;;  %v1807_v52 = vrot.slane %v1805_v47, 5  ;;  %v1819_v28 = vshll.u32 %v1758_v9, 16  ;;  %v2216_v16 = vld [vmem:[#allocation3 + $0x3c] sm:$0x1]  ;;  %3038 = vmatprep.subr.bf16.mxu1 %v3105_v4 }
 0x262   : > { %v2112_v38 = vrot.slane %v2111_v36, 4  ;;  %v2047_v44 = vld [vmem:[#allocation3 + $0xc] sm:$0x1]  ;;  %v2103_v23 = vsel %vm3358_vm15, %v2098_v17, %v2102_v10  ;;  %v1802_v42 = vor.u32 %v1801_v21, %v1798_v18  ;;  %v1812_v56 = vrot.slane %v1810_v24, 4  ;;  %v2217_v45 = vld [vmem:[#allocation3 + $0x40] sm:$0xe]  ;;  %2331 = vrot.lane.b32.xlu1 %v3099_v35, %s3129_s29  ;;  %3039 = vmatpush3.bf16.msra.mxu1 %v3105_v4 }
 0x263   : > { %v1815_v37 = vrot.slane %v1813_v27, 5  ;;  %v2218_v30 = vld [vmem:[#allocation3 + $0x44] sm:$0x1]  ;;  %1891 = vrot.lane.b32.xlu0 %v2928_v2, %s3123_s11  ;;  %v1821_v60 = vrot.slane %v1819_v28, 5  ;;  %v2958_v31 = vrot.slane %v2215_v22, 9  ;;  %v2261_v32 = vrot.slane %v2216_v16, 5 }
 0x264   : > { %v2117_v59 = vsel %vm3358_vm15, %v2112_v38, %v2116_v12  ;;  %v2048_v33 = vld [vmem:[#allocation3 + $0x10] sm:$0xf]  ;;  %v1803_v54 = vrot.slane %v1802_v42, 4  ;;  %v2959_v20 = vrot.slane %v2217_v45, 9  ;;  %v2049_v46 = vld [vmem:[#allocation3 + $0x14] sm:$0x1]  ;;  %v2469_v35 = vsel %vm3358_vm15, %v3663_v40, %v3667_v53 }
 0x265   : > { %v2949_v34 = vcombine.low %v2103_v23, %v2117_v59  ;;  %v3100_v7 = vld [vmem:[#allocation3 + $0x28] ss:$8 sps:$4 sm:$0xff]   ;;  %v1816_v61 = vor.u32 %v1815_v37, %v1812_v56  ;;  %v2262_v48 = vsel %vm3350_vm14, %v2958_v31, %v2261_v32  ;;  %v2265_v49 = vrot.slane %v2218_v30, 5  ;;  %v1921_v58 = vld [vmem:[#allocation3 + $0x34] sm:$0x1] }
 0x266   : > { %v2063_v51 = vshrl.u32 %v2046_v1, 16  ;;  %v2066_v13 = vshll.u32 %v2046_v1, 16  ;;  %v1920_v55 = vld [vmem:[#allocation3 + $0x30] sm:$0xe]  ;;  %v1808_v25 = vsel %vm3358_vm15, %v1803_v54, %v1807_v52  ;;  %v2072_v63 = vshll.u32 %v2047_v44, 16 }
 0x267   : > { %v1817_v62 = vrot.slane %v1816_v61, 4  ;;  %v2077_v0 = vshrl.u32 %v2048_v33, 16  ;;  %v1922_v3 = vld [vmem:[#allocation3 + $0x38] sm:$0xe]  ;;  %2188 = vrot.lane.b32.xlu1 %v2949_v34, %s3125_s13  ;;  %2033 = vrot.lane.b32.xlu0 %v3100_v7, %s3122_s10  ;;  %v2266_v5 = vsel %vm3350_vm14, %v2959_v20, %v2265_v49  ;;  %v2080_v8 = vshll.u32 %v2048_v33, 16 }
 0x268   : > { %v2065_v6 = vrot.slane %v2063_v51, 4  ;;  %v2068_v26 = vrot.slane %v2066_v13, 5  ;;  %v1923_v9 = vld [vmem:[#allocation3 + $0x3c] sm:$0x1]  ;;  %v2963_v10 = vcombine.low %v2262_v48, %v2266_v5  ;;  %v2342_v14 = vld [vmem:[#allocation3 + $0x10] sm:$0xf] }
 0x269   : > { %v1822_v15 = vsel %vm3358_vm15, %v1817_v62, %v1821_v60  ;;  %v2079_v11 = vrot.slane %v2077_v0, 4  ;;  %v3101_v36 = vld [vmem:[#allocation3 + $0x30] ss:$8 sps:$4 sm:$0xff]   ;;  %v2082_v47 = vrot.slane %v2080_v8, 5  ;;  %v2086_v18 = vshll.u32 %v2049_v46, 16  ;;  %v3106_v51 = vld [vmem:[%s3869_s4 + $0x10] sm:$0xff]  }
 0x26a   : > { %v2929_v17 = vcombine.low %v1808_v25, %v1822_v15  ;;  %v2069_v12 = vor.u32 %v2068_v26, %v2065_v6  ;;  %v2938_v21 = vrot.slane %v1920_v55, 9  ;;  %v1966_v24 = vrot.slane %v1921_v58, 5  ;;  %v2343_v1 = vld [vmem:[#allocation3 + $0x14] sm:$0x1]  ;;  %v2344_v28 = vld [vmem:[#allocation3 + $0x18] sm:$0xf]  ;;  %3040 = vmatprep.subr.bf16.mxu1 %v3106_v51 }
 0x26b   : > { %v2939_v27 = vrot.slane %v1922_v3, 9  ;;  %v1970_v22 = vrot.slane %v1923_v9, 5  ;;  %2329 = vrot.lane.b32.xlu0 %v3101_v36, %s3129_s29  ;;  %v2074_v38 = vrot.slane %v2072_v63, 5  ;;  %v2083_v52 = vor.u32 %v2082_v47, %v2079_v11  ;;  %v2345_v42 = vld [vmem:[#allocation3 + $0x1c] sm:$0x1]  ;;  %3041 = vmatpush3.bf16.msra.mxu1 %v3106_v51  ;;  %v3107_v11 = vld [vmem:[%s3869_s4 + $0x18] sm:$0xff]   ;;  %s276_s29 = scalar_lea.vmem %s3872_s7, %s2846_s26 }
 0x26c   : > { %1893 = vrot.lane.b32.xlu1 %v2929_v17, %s3123_s11  ;;  %v2070_v2 = vrot.slane %v2069_v12, 4  ;;  %v2359_v16 = vshrl.u32 %v2342_v14, 16  ;;  %v2088_v44 = vrot.slane %v2086_v18, 5  ;;  %v1967_v41 = vsel %vm3350_vm14, %v2938_v21, %v1966_v24  ;;  %v2346_v37 = vld [vmem:[#allocation3 + $0x20] sm:$0xf]  ;;  %3042 = vmatprep.subr.bf16.mxu1 %v3107_v11 }
 0x26d   : > { %v1971_v23 = vsel %vm3350_vm14, %v2939_v27, %v1970_v22  ;;  %v2362_v56 = vshll.u32 %v2342_v14, 16  ;;  %v2084_v30 = vrot.slane %v2083_v52, 4  ;;  %v2368_v60 = vshll.u32 %v2343_v1, 16  ;;  %v2347_v31 = vld [vmem:[#allocation3 + $0x24] sm:$0x1] }
 0x26e   : > { %v2075_v45 = vsel %vm3358_vm15, %v2070_v2, %v2074_v38  ;;  %v2361_v59 = vrot.slane %v2359_v16, 4  ;;  %v2943_v32 = vcombine.low %v1967_v41, %v1971_v23  ;;  %v2373_v34 = vshrl.u32 %v2344_v28, 16  ;;  %v2348_v54 = vld [vmem:[#allocation3 + $0x28] sm:$0xf]  ;;  %v2349_v46 = vld [vmem:[#allocation3 + $0x2c] sm:$0x1] }
 0x26f   : > { %v2364_v33 = vrot.slane %v2362_v56, 5  ;;  %v2376_v7 = vshll.u32 %v2344_v28, 16  ;;  %v2089_v61 = vsel %vm3358_vm15, %v2084_v30, %v2088_v44  ;;  %v2382_v20 = vshll.u32 %v2345_v42, 16  ;;  %v2503_v62 = vld [vmem:[#allocation3 + $0x20] sm:$0xe]  ;;  %3043 = vmatpush3.bf16.msra.mxu1 %v3107_v11 }
 0x270   : > { %2285 = vrot.lane.b32.xlu1 %v2963_v10, %s3130_s30  ;;  %v2387_v48 = vshrl.u32 %v2346_v37, 16  ;;  %v2390_v49 = vshll.u32 %v2346_v37, 16  ;;  %v2948_v13 = vcombine.low %v2075_v45, %v2089_v61  ;;  %v2375_v58 = vrot.slane %v2373_v34, 4  ;;  %v2504_v63 = vld [vmem:[#allocation3 + $0x24] sm:$0x1] }
 0x271   : > { %v2365_v55 = vor.u32 %v2364_v33, %v2361_v59  ;;  %v2378_v25 = vrot.slane %v2376_v7, 5  ;;  %v2370_v0 = vrot.slane %v2368_v60, 5  ;;  %v2396_v5 = vshll.u32 %v2347_v31, 16  ;;  %v2505_v6 = vld [vmem:[#allocation3 + $0x28] sm:$0xe] }
 0x272   : > { %v2389_v3 = vrot.slane %v2387_v48, 4  ;;  %v2392_v4 = vrot.slane %v2390_v49, 5  ;;  %2186 = vrot.lane.b32.xlu0 %v2948_v13, %s3125_s13  ;;  %v2401_v9 = vshrl.u32 %v2348_v54, 16  ;;  %v2404_v15 = vshll.u32 %v2348_v54, 16  ;;  %v2506_v10 = vld [vmem:[#allocation3 + $0x2c] sm:$0x1] }
 0x273   : > { %v2366_v26 = vrot.slane %v2365_v55, 4  ;;  %v2379_v8 = vor.u32 %v2378_v25, %v2375_v58  ;;  %v2384_v14 = vrot.slane %v2382_v20, 5  ;;  %v2398_v36 = vrot.slane %v2396_v5, 5  ;;  %v1759_v47 = vld [vmem:[#allocation3 + $0x20] sm:$0xf] }
 0x274   : > { %1990 = vrot.lane.b32.xlu1 %v2943_v32, %s3127_s15  ;;  %v2393_v17 = vor.u32 %v2392_v4, %v2389_v3  ;;  %v2410_v12 = vshll.u32 %v2349_v46, 16  ;;  %v2403_v24 = vrot.slane %v2401_v9, 4  ;;  %v2406_v27 = vrot.slane %v2404_v15, 5  ;;  %v1760_v52 = vld [vmem:[#allocation3 + $0x24] sm:$0x1] }
 0x275   : > { %v2371_v18 = vsel %vm3358_vm15, %v2366_v26, %v2370_v0  ;;  %v2380_v21 = vrot.slane %v2379_v8, 4  ;;  %v2974_v1 = vrot.slane %v2503_v62, 9  ;;  %v2541_v2 = vrot.slane %v2504_v63, 5  ;;  %v1761_v41 = vld [vmem:[#allocation3 + $0x28] sm:$0xf] }
 0x276   : > { %v2394_v22 = vrot.slane %v2393_v17, 4  ;;  %v2975_v38 = vrot.slane %v2505_v6, 9  ;;  %v2407_v16 = vor.u32 %v2406_v27, %v2403_v24  ;;  %v2545_v44 = vrot.slane %v2506_v10, 5  ;;  %v1762_v23 = vld [vmem:[#allocation3 + $0x2c] sm:$0x1] }
 0x277   : > { %v2385_v28 = vsel %vm3358_vm15, %v2380_v21, %v2384_v14  ;;  %v1824_v42 = vshrl.u32 %v1759_v47, 16  ;;  %v2412_v45 = vrot.slane %v2410_v12, 5  ;;  %v1827_v30 = vshll.u32 %v1759_v47, 16  ;;  %v1916_v59 = vld [vmem:[#allocation3 + $0x20] sm:$0xe] }
 0x278   : > { %v2968_v56 = vcombine.low %v2371_v18, %v2385_v28  ;;  %v2399_v37 = vsel %vm3358_vm15, %v2394_v22, %v2398_v36  ;;  %v1917_v60 = vld [vmem:[#allocation3 + $0x24] sm:$0x1]  ;;  %v2408_v31 = vrot.slane %v2407_v16, 4  ;;  %v2546_v32 = vsel %vm3350_vm14, %v2975_v38, %v2545_v44  ;;  %v1918_v7 = vld [vmem:[#allocation3 + $0x28] sm:$0xe] }
 0x279   : > { %v1826_v33 = vrot.slane %v1824_v42, 4  ;;  %v1833_v34 = vshll.u32 %v1760_v52, 16  ;;  %v2542_v54 = vsel %vm3350_vm14, %v2974_v1, %v2541_v2  ;;  %v1829_v61 = vrot.slane %v1827_v30, 5  ;;  %v1919_v48 = vld [vmem:[#allocation3 + $0x2c] sm:$0x1] }
 0x27a   : > { %2482 = vrot.lane.b32.xlu0 %v2968_v56, %s3132_s20  ;;  %v1838_v20 = vshrl.u32 %v1761_v41, 16  ;;  %v1841_v46 = vshll.u32 %v1761_v41, 16  ;;  %v2413_v49 = vsel %vm3358_vm15, %v2408_v31, %v2412_v45  ;;  %v2981_v51 = vcombine.low %v2542_v54, %v2546_v32  ;;  %v2058_v58 = vld [vmem:[#allocation3 + $0x38] sm:$0xf]  ;;  %v2059_v3 = vld [vmem:[#allocation3 + $0x3c] sm:$0x1] }
 0x27b   : > { %v1847_v13 = vshll.u32 %v1762_v23, 16  ;;  %v2936_v55 = vrot.slane %v1916_v59, 9  ;;  %v2969_v25 = vcombine.low %v2399_v37, %v2413_v49  ;;  %v1830_v62 = vor.u32 %v1829_v61, %v1826_v33  ;;  %v2060_v4 = vld [vmem:[#allocation3 + $0x40] sm:$0xf]  ;;  %v2061_v9 = vld [vmem:[#allocation3 + $0x44] sm:$0x1] }
 0x27c   : > { %v1840_v63 = vrot.slane %v1838_v20, 4  ;;  %v1843_v0 = vrot.slane %v1841_v46, 5  ;;  %v1835_v5 = vrot.slane %v1833_v34, 5  ;;  %v1958_v6 = vrot.slane %v1917_v60, 5  ;;  %v2211_v17 = vld [vmem:[#allocation3 + $0x28] sm:$0xe] }
 0x27d   : > { %v2937_v26 = vrot.slane %v1918_v7, 9  ;;  %v1962_v8 = vrot.slane %v1919_v48, 5  ;;  %2484 = vrot.lane.b32.xlu1 %v2969_v25, %s3132_s20  ;;  %v1831_v15 = vrot.slane %v1830_v62, 4  ;;  %v2147_v11 = vshrl.u32 %v2058_v58, 16  ;;  %v2212_v21 = vld [vmem:[#allocation3 + $0x2c] sm:$0x1] }
 0x27e   : > { %2577 = vrot.lane.b32.xlu0 %v2981_v51, %s3131_s8  ;;  %v1844_v10 = vor.u32 %v1843_v0, %v1840_v63  ;;  %v2150_v14 = vshll.u32 %v2058_v58, 16  ;;  %v1849_v36 = vrot.slane %v1847_v13, 5  ;;  %v1959_v12 = vsel %vm3350_vm14, %v2936_v55, %v1958_v6  ;;  %v2213_v24 = vld [vmem:[#allocation3 + $0x30] sm:$0xe]  ;;  %v2214_v38 = vld [vmem:[#allocation3 + $0x34] sm:$0x1] }
 0x27f   : > { %v1963_v47 = vsel %vm3350_vm14, %v2937_v26, %v1962_v8  ;;  %v2161_v18 = vshrl.u32 %v2060_v4, 16  ;;  %v2149_v1 = vrot.slane %v2147_v11, 4  ;;  %v2156_v2 = vshll.u32 %v2059_v3, 16  ;;  %v1763_v41 = vld [vmem:[#allocation3 + $0x30] sm:$0xf] }
 0x280   : > { %v1845_v27 = vrot.slane %v1844_v10, 4  ;;  %v2942_v22 = vcombine.low %v1959_v12, %v1963_v47  ;;  %v1836_v52 = vsel %vm3358_vm15, %v1831_v15, %v1835_v5  ;;  %v2152_v28 = vrot.slane %v2150_v14, 5  ;;  %v1764_v45 = vld [vmem:[#allocation3 + $0x34] sm:$0x1]  ;;  %v1765_v32 = vld [vmem:[#allocation3 + $0x38] sm:$0xf] }
 0x281   : > { %v2163_v16 = vrot.slane %v2161_v18, 4  ;;  %v2164_v44 = vshll.u32 %v2060_v4, 16  ;;  %vm1746_vm6 = vcmask 64512   ;;  %v2170_v42 = vshll.u32 %v2061_v9, 16  ;;  %v1766_v46 = vld [vmem:[#allocation3 + $0x3c] sm:$0x1] }
 0x282   : > { %v1850_v23 = vsel %vm3358_vm15, %v1845_v27, %v1849_v36  ;;  %1988 = vrot.lane.b32.xlu0 %v2942_v22, %s3127_s15  ;;  %v2956_v56 = vrot.slane %v2211_v17, 9  ;;  %v2253_v37 = vrot.slane %v2212_v21, 5  ;;  %v2153_v59 = vor.u32 %v2152_v28, %v2149_v1  ;;  %v2054_v25 = vld [vmem:[#allocation3 + $0x28] sm:$0xf]  ;;  %v2055_v4 = vld [vmem:[#allocation3 + $0x2c] sm:$0x1] }
 0x283   : > { %v2930_v30 = vcombine.low %v1836_v52, %v1850_v23  ;;  %v2166_v60 = vrot.slane %v2164_v44, 5  ;;  %v2957_v31 = vrot.slane %v2213_v24, 9  ;;  %v2158_v33 = vrot.slane %v2156_v2, 5  ;;  %v2056_v9 = vld [vmem:[#allocation3 + $0x30] sm:$0xf] }
 0x284   : > { %v2254_v34 = vsel %vm3350_vm14, %v2956_v56, %v2253_v37  ;;  %v2257_v7 = vrot.slane %v2214_v38, 5  ;;  %v1852_v54 = vshrl.u32 %v1763_v41, 16  ;;  %v2154_v61 = vrot.slane %v2153_v59, 4  ;;  %v2057_v11 = vld [vmem:[#allocation3 + $0x34] sm:$0x1] }
 0x285   : > { %1895 = vrot.lane.b32.xlu1 %v2930_v30, %s3123_s11  ;;  %v2167_v20 = vor.u32 %v2166_v60, %v2163_v16  ;;  %v1855_v48 = vshll.u32 %v1763_v41, 16  ;;  %v1861_v49 = vshll.u32 %v1764_v45, 16  ;;  %v1866_v55 = vshrl.u32 %v1765_v32, 16  ;;  %v2354_v36 = vld [vmem:[#allocation3 + $0x40] sm:$0xf] }
 0x286   : > { %v2258_v51 = vsel %vm3350_vm14, %v2957_v31, %v2257_v7  ;;  %v1854_v13 = vrot.slane %v1852_v54, 4  ;;  %v1869_v58 = vshll.u32 %v1765_v32, 16  ;;  %v2172_v63 = vrot.slane %v2170_v42, 5  ;;  %v2355_v24 = vld [vmem:[#allocation3 + $0x44] sm:$0x1] }
 0x287   : > { %v2168_v62 = vrot.slane %v2167_v20, 4  ;;  %v2962_v0 = vcombine.low %v2254_v34, %v2258_v51  ;;  %v1857_v3 = vrot.slane %v1855_v48, 5  ;;  %v2159_v5 = vsel %vm3358_vm15, %v2154_v61, %v2158_v33  ;;  %v3102_v27 = vld [vmem:[#allocation3] ss:$8 sps:$4 sm:$0xff]   ;;  %v2350_v52 = vld [vmem:[#allocation3 + $0x30] sm:$0xf] }
 0x288   : > { %v1868_v6 = vrot.slane %v1866_v55, 4  ;;  %v1871_v26 = vrot.slane %v1869_v58, 5  ;;  %v1875_v8 = vshll.u32 %v1766_v46, 16  ;;  %v2119_v14 = vshrl.u32 %v2054_v25, 16  ;;  %v2352_v23 = vld [vmem:[#allocation3 + $0x38] sm:$0xf] }
 0x289   : > { %v2173_v15 = vsel %vm3358_vm15, %v2168_v62, %v2172_v63  ;;  %2283 = vrot.lane.b32.xlu0 %v2962_v0, %s3130_s30  ;;  %v1858_v10 = vor.u32 %v1857_v3, %v1854_v13  ;;  %v2122_v17 = vshll.u32 %v2054_v25, 16  ;;  %v1863_v47 = vrot.slane %v1861_v49, 5  ;;  %1747 = vst.msk [vmem:[#allocation4] sm:$0xff] %vm1746_vm6, %v3102_v27  ;;  %v3103_v30 = vld [vmem:[#allocation3 + $0x10] ss:$8 sps:$4 sm:$0xff]  }
 0x28a   : > { %v2951_v12 = vcombine.low %v2159_v5, %v2173_v15  ;;  %v1872_v18 = vor.u32 %v1871_v26, %v1868_v6  ;;  %v2128_v21 = vshll.u32 %v2055_v4, 16  ;;  %v2121_v1 = vrot.slane %v2119_v14, 4  ;;  %v2351_v33 = vld [vmem:[#allocation3 + $0x34] sm:$0x1]  ;;  %v2353_v34 = vld [vmem:[#allocation3 + $0x3c] sm:$0x1] }
 0x28b   : > { %v1859_v22 = vrot.slane %v1858_v10, 4  ;;  %v2124_v2 = vrot.slane %v2122_v17, 5  ;;  %v2133_v38 = vshrl.u32 %v2056_v9, 16  ;;  %v1877_v16 = vrot.slane %v1875_v8, 5  ;;  %v2511_v46 = vld [vmem:[#allocation3 + $0x40] sm:$0xe] }
 0x28c   : > { %2192 = vrot.lane.b32.xlu1 %v2951_v12, %s3125_s13  ;;  %v1873_v28 = vrot.slane %v1872_v18, 4  ;;  %v2136_v44 = vshll.u32 %v2056_v9, 16  ;;  %v2142_v41 = vshll.u32 %v2057_v11, 16  ;;  %v2443_v45 = vshrl.u32 %v2354_v36, 16  ;;  %1748 = vst.msk [vmem:[#allocation4 + $0x8] sm:$0xff] %vm1746_vm6, %v3103_v30 }
 0x28d   : > { %v1864_v42 = vsel %vm3358_vm15, %v1859_v22, %v1863_v47  ;;  %v2125_v56 = vor.u32 %v2124_v2, %v2121_v1  ;;  %v2135_v37 = vrot.slane %v2133_v38, 4  ;;  %v2130_v60 = vrot.slane %v2128_v21, 5  ;;  %v3108_v48 = vld [vmem:[#allocation3 + $0x20] ss:$8 sps:$4 sm:$0xff]   ;;  %v2512_v58 = vld [vmem:[#allocation3 + $0x44] sm:$0x1] }
 0x28e   : > { %v1878_v59 = vsel %vm3358_vm15, %v1873_v28, %v1877_v16  ;;  %v2138_v31 = vrot.slane %v2136_v44, 5  ;;  %v2446_v32 = vshll.u32 %v2354_v36, 16  ;;  %v2445_v61 = vrot.slane %v2443_v45, 4  ;;  %1749 = vst.msk [vmem:[#allocation4 + $0x10] sm:$0xff] %vm1746_vm6, %v3108_v48  ;;  %v3110_v10 = vld [vmem:[#allocation3 + $0x30] ss:$8 sps:$4 sm:$0xff]  }
 0x28f   : > { %v2931_v7 = vcombine.low %v1864_v42, %v1878_v59  ;;  %v2126_v54 = vrot.slane %v2125_v56, 4  ;;  %v2452_v20 = vshll.u32 %v2355_v24, 16  ;;  %v2415_v13 = vshrl.u32 %v2350_v52, 16  ;;  %1750 = vst.msk [vmem:[#allocation4 + $0x18] sm:$0xff] %vm1746_vm6, %v3110_v10  ;;  %v2507_v27 = vld [vmem:[#allocation3 + $0x30] sm:$0xe] }
 0x290   : > { %v2139_v49 = vor.u32 %v2138_v31, %v2135_v37  ;;  %v2448_v51 = vrot.slane %v2446_v32, 5  ;;  %v2418_v55 = vshll.u32 %v2350_v52, 16  ;;  %v2144_v62 = vrot.slane %v2142_v41, 5  ;;  %v2508_v22 = vld [vmem:[#allocation3 + $0x34] sm:$0x1] }
 0x291   : > { %1897 = vrot.lane.b32.xlu1 %v2931_v7, %s3123_s11  ;;  %v2131_v25 = vsel %vm3358_vm15, %v2126_v54, %v2130_v60  ;;  %v2454_v63 = vrot.slane %v2452_v20, 5  ;;  %v2429_v0 = vshrl.u32 %v2352_v23, 16  ;;  %v2417_v5 = vrot.slane %v2415_v13, 4  ;;  %v2509_v44 = vld [vmem:[#allocation3 + $0x38] sm:$0xe] }
 0x292   : > { %v2140_v3 = vrot.slane %v2139_v49, 4  ;;  %v2449_v4 = vor.u32 %v2448_v51, %v2445_v61  ;;  %v2420_v6 = vrot.slane %v2418_v55, 5  ;;  %v2424_v26 = vshll.u32 %v2351_v33, 16  ;;  %v2510_v41 = vld [vmem:[#allocation3 + $0x3c] sm:$0x1] }
 0x293   : > { %v2431_v8 = vrot.slane %v2429_v0, 4  ;;  %v2432_v9 = vshll.u32 %v2352_v23, 16  ;;  %v2438_v15 = vshll.u32 %v2353_v34, 16  ;;  %v2978_v36 = vrot.slane %v2511_v46, 9  ;;  %v3109_v42 = vld [vmem:[%s3869_s4 + $0x20] ss:$0 sps:$4 sm:$0xff]  }
 0x294   : > { %v2145_v11 = vsel %vm3358_vm15, %v2140_v3, %v2144_v62  ;;  %v2450_v14 = vrot.slane %v2449_v4, 4  ;;  %v2421_v17 = vor.u32 %v2420_v6, %v2417_v5  ;;  %v2557_v18 = vrot.slane %v2512_v58, 5 }
 0x295   : > { %v2950_v12 = vcombine.low %v2131_v25, %v2145_v11  ;;  %v2434_v47 = vrot.slane %v2432_v9, 5  ;;  %v2426_v2 = vrot.slane %v2424_v26, 5  ;;  %v2440_v52 = vrot.slane %v2438_v15, 5 }
 0x296   : > { %v2455_v21 = vsel %vm3358_vm15, %v2450_v14, %v2454_v63  ;;  %v2422_v24 = vrot.slane %v2421_v17, 4  ;;  %v2558_v28 = vsel %vm3350_vm14, %v2978_v36, %v2557_v18  ;;  %v2562_v16 = vsel %vm3350_vm14, %v2979_v39, %v2561_v50 }
 0x297   : > { %2190 = vrot.lane.b32.xlu0 %v2950_v12, %s3125_s13  ;;  %v2971_v1 = vcombine.low %v2455_v21, %v2469_v35  ;;  %v2435_v38 = vor.u32 %v2434_v47, %v2431_v8  ;;  %v2976_v35 = vrot.slane %v2507_v27, 9  ;;  %v2549_v23 = vrot.slane %v2508_v22, 5  ;;  %v2993_v47 = vld [vmem:[%s3870_s5] ss:$0 sm:$0xff] }
 0x298   : > { %v2427_v40 = vsel %vm3358_vm15, %v2422_v24, %v2426_v2  ;;  %v2983_v29 = vcombine.low %v2558_v28, %v2562_v16  ;;  %v2977_v56 = vrot.slane %v2509_v44, 9  ;;  %v2553_v39 = vrot.slane %v2510_v41, 5  ;;  %v2994_v21 = vld [vmem:[%s3871_s6] ss:$0 sm:$0xff] }
 0x299   : > { %2488 = vrot.lane.b32.xlu1 %v2971_v1, %s3132_s20  ;;  %v2436_v53 = vrot.slane %v2435_v38, 4  ;;  %vm2645_vm7 = vcmask 1043456   ;;  %v2550_v37 = vsel %vm3350_vm14, %v2976_v35, %v2549_v23 }
 0x29a   : > { %3055 = vmatprep.subr.msk.bf16.mxu1 %vm2645_vm7, %v3109_v42  ;;  %v2647_v45 = vsel %vm2645_vm7, %v3109_v42, 0  ;;  %v2554_v30 = vsel %vm3350_vm14, %v2977_v56, %v2553_v39  ;;  %vm2198_vm14 = vcmask 326912  }
 0x29b   : > { %v2441_v19 = vsel %vm3358_vm15, %v2436_v53, %v2440_v52  ;;  %3045 = vmatpush3.bf16.msra.mxu1 %v2647_v45  ;;  %v2982_v57 = vcombine.low %v2550_v37, %v2554_v30  ;;  %vm1996_vm15 = vcmask 195712  }
 0x29c   : > { %v2970_v50 = vcombine.low %v2427_v40, %v2441_v19 }
 0x29d   : > { %2581 = vrot.lane.b32.xlu1 %v2983_v29, %s3131_s8 }
 0x29e   : > { %2486 = vrot.lane.b32.xlu0 %v2970_v50, %s3132_s20 }
 0x2a2   : > { %2579 = vrot.lane.b32.xlu0 %v2982_v57, %s3131_s8 }
 0x2b6   : > { %v2032_v59 = vpop.permute.xlu1 %2031 }
 0x2b7   : > { %v2030_v60 = vpop.permute.xlu0 %2029 }
 0x2bb   : > { %v2326_v32 = vpop.permute.xlu0 %2325 }
 0x2bc   : > { %v2282_v31 = vpop.permute.xlu1 %2281 }
 0x2c0   : > { %v1987_v33 = vpop.permute.xlu1 %1986 }
 0x2c7   : > { %v1985_v34 = vpop.permute.xlu0 %1984 }
 0x2cc   : > { %v2328_v7 = vpop.permute.xlu1 %2327  ;;  %v2280_v54 = vpop.permute.xlu0 %2279 }
 0x2d0   : > { %v2036_v61 = vpop.permute.xlu1 %2035 }
 0x2d1   : > { %v2576_v20 = vpop.permute.xlu0 %2575 }
 0x2d4   : > { %v2332_v46 = vpop.permute.xlu1 %2331 }
 0x2d5   : > { %v1892_v48 = vpop.permute.xlu0 %1891 }
 0x2d6   : > { %1904 = vst.msk [vmem:[#allocation4] sm:$0xff] %vm1903_vm13, %v1892_v48 }
 0x2d7   : > { %1997 = vst.msk [vmem:[#allocation4] sm:$0xff] %vm1996_vm15, %v1985_v34 }
 0x2d8   : > { %2042 = vst.msk [vmem:[#allocation4] sm:$0xff] %vm2041_vm0, %v2030_v60 }
 0x2d9   : > { %v2189_v43 = vpop.permute.xlu1 %2188  ;;  %v2034_v49 = vpop.permute.xlu0 %2033 }
 0x2dd   : > { %v2330_v13 = vpop.permute.xlu0 %2329 }
 0x2de   : > { %v1894_v51 = vpop.permute.xlu1 %1893 }
 0x2df   : > { %1905 = vst.msk [vmem:[#allocation4 + $0x8] sm:$0xff] %vm1903_vm13, %v1894_v51 }
 0x2e0   : > { %1998 = vst.msk [vmem:[#allocation4 + $0x8] sm:$0xff] %vm1996_vm15, %v1987_v33 }
 0x2e1   : > { %2043 = vst.msk [vmem:[#allocation4 + $0x8] sm:$0xff] %vm2041_vm0, %v2032_v59 }
 0x2e2   : > { %2200 = vst.msk [vmem:[#allocation4 + $0x8] sm:$0xff] %vm2198_vm14, %v2189_v43  ;;  %v2286_v55 = vpop.permute.xlu1 %2285 }
 0x2e3   : > { %2293 = vst.msk [vmem:[#allocation4 + $0x8] sm:$0xff] %vm2291_vm1, %v2282_v31 }
 0x2e4   : > { %2339 = vst.msk [vmem:[#allocation4 + $0x8] sm:$0xff] %vm2337_vm2, %v2328_v7  ;;  %v2187_v58 = vpop.permute.xlu0 %2186 }
 0x2e5   : > { %2199 = vst.msk [vmem:[#allocation4] sm:$0xff] %vm2198_vm14, %v2187_v58 }
 0x2e6   : > { %2292 = vst.msk [vmem:[#allocation4] sm:$0xff] %vm2291_vm1, %v2280_v54  ;;  %v1991_v25 = vpop.permute.xlu1 %1990 }
 0x2e7   : > { %2338 = vst.msk [vmem:[#allocation4] sm:$0xff] %vm2337_vm2, %v2326_v32 }
 0x2ec   : > { %v2483_v62 = vpop.permute.xlu0 %2482 }
 0x2ed   : > { %2495 = vst.msk [vmem:[#allocation4] sm:$0xff] %vm2494_vm3, %v2483_v62 }
 0x2ee   : > { %2588 = vst.msk [vmem:[#allocation4] sm:$0xff] %vm2587_vm4, %v2576_v20 }
 0x2ef   : > { %v2485_v63 = vpop.permute.xlu1 %2484 }
 0x2f0   : > { %v2578_v0 = vpop.permute.xlu0 %2577  ;;  %2496 = vst.msk [vmem:[#allocation4 + $0x8] sm:$0xff] %vm2494_vm3, %v2485_v63 }
 0x2f1   : > { %2589 = vst.msk [vmem:[#allocation4 + $0x8] sm:$0xff] %vm2587_vm4, %v2578_v0 }
 0x2f4   : > { %v1989_v4 = vpop.permute.xlu0 %1988 }
 0x2f5   : > { %v2592_v3 = vld [vmem:[#allocation4] sm:$0xff] }
 0x2f6   : > { %3046 = vmatprep.mubr.msk.bf16.mxu1 %vm2632_vm5, %v2592_v3 }
 0x2f7   : > { %v1896_v5 = vpop.permute.xlu1 %1895 }
 0x2f8   : > { %1906 = vst.msk [vmem:[#allocation4 + $0x10] sm:$0xff] %vm1903_vm13, %v1896_v5  ;;  %v2593_v6 = vld [vmem:[#allocation4 + $0x8] sm:$0xff] }
 0x2f9   : > { %1999 = vst.msk [vmem:[#allocation4 + $0x10] sm:$0xff] %vm1996_vm15, %v1989_v4  ;;  %3047 = vmatmul.mubr.msk.bf16.vlgmr.msra.gmra.mrb[0].mxu1 %vm2632_vm5, %v2593_v6 }
 0x2fa   : > { %2044 = vst.msk [vmem:[#allocation4 + $0x10] sm:$0xff] %vm2041_vm0, %v2034_v49 }
 0x2fb   : > { %v2284_v8 = vpop.permute.xlu0 %2283 }
 0x2fe   : > { %v2193_v26 = vpop.permute.xlu1 %2192 }
 0x303   : > { %v1898_v9 = vpop.permute.xlu1 %1897 }
 0x304   : > { %1907 = vst.msk [vmem:[#allocation4 + $0x18] sm:$0xff] %vm1903_vm13, %v1898_v9 }
 0x305   : > { %2000 = vst.msk [vmem:[#allocation4 + $0x18] sm:$0xff] %vm1996_vm15, %v1991_v25 }
 0x306   : > { %2045 = vst.msk [vmem:[#allocation4 + $0x18] sm:$0xff] %vm2041_vm0, %v2036_v61 }
 0x307   : > { %2202 = vst.msk [vmem:[#allocation4 + $0x18] sm:$0xff] %vm2198_vm14, %v2193_v26 }
 0x308   : > { %2295 = vst.msk [vmem:[#allocation4 + $0x18] sm:$0xff] %vm2291_vm1, %v2286_v55 }
 0x309   : > { %v2191_v15 = vpop.permute.xlu0 %2190  ;;  %2341 = vst.msk [vmem:[#allocation4 + $0x18] sm:$0xff] %vm2337_vm2, %v2332_v46 }
 0x30a   : > { %2201 = vst.msk [vmem:[#allocation4 + $0x10] sm:$0xff] %vm2198_vm14, %v2191_v15 }
 0x30b   : > { %2294 = vst.msk [vmem:[#allocation4 + $0x10] sm:$0xff] %vm2291_vm1, %v2284_v8  ;;  %v2489_v10 = vpop.permute.xlu1 %2488 }
 0x30c   : > { %2340 = vst.msk [vmem:[#allocation4 + $0x10] sm:$0xff] %vm2337_vm2, %v2330_v13 }
 0x30d   : > { %2498 = vst.msk [vmem:[#allocation4 + $0x18] sm:$0xff] %vm2494_vm3, %v2489_v10 }
 0x30f   : > { %v2582_v11 = vpop.permute.xlu1 %2581 }
 0x310   : > { %v2487_v14 = vpop.permute.xlu0 %2486  ;;  %2591 = vst.msk [vmem:[#allocation4 + $0x18] sm:$0xff] %vm2587_vm4, %v2582_v11 }
 0x311   : > { %2497 = vst.msk [vmem:[#allocation4 + $0x10] sm:$0xff] %vm2494_vm3, %v2487_v14 }
 0x314   : > { %v2580_v17 = vpop.permute.xlu0 %2579 }
 0x315   : > { %2590 = vst.msk [vmem:[#allocation4 + $0x10] sm:$0xff] %vm2587_vm4, %v2580_v17 }
 0x317   : > { %v2595_v12 = vld [vmem:[#allocation4 + $0x18] sm:$0xff] }
 0x31c   : > { %v2594_v36 = vld [vmem:[#allocation4 + $0x10] sm:$0xff] }
 0x31d   : > { %3050 = vmatprep.mubr.msk.bf16.mxu1 %vm2632_vm5, %v2594_v36 }
 0x31e   : > { %3051 = vmatmul.mubr.msk.bf16.gmra.mrb[4].mxu1 %vm2632_vm5, %v2595_v12 }
 0x3cc   : > { %v3048_v18 = vpop.f32.mrb[0].mxu1 }
 0x3cd   : > { %v2683_v24 = vpop.f32.mrb[1].mxu1  ;;  %v2723_v52 = vmul.f32 %v3048_v18, %v2993_v47 }
 0x3ce   : > { %v2721_v27 = vmul.f32 %v2993_v47, %v2683_v24  ;;  %v3049_v22 = vpop.f32.mrb[2].mxu1 }
 0x3cf   : > { %v2686_v1 = vpop.f32.mrb[3].mxu1  ;;  %v2738_v44 = vadd.f32 %v2994_v21, %v2723_v52  ;;  %v2724_v41 = vmul.f32 %v3049_v22, %v2993_v47 }
 0x3d0   : > { %v2722_v2 = vmul.f32 %v2993_v47, %v2686_v1  ;;  %v2736_v38 = vadd.f32 %v2994_v21, %v2721_v27 }
 0x3d1   : > { %v2746_v53 = vmax.f32 %v2738_v44, 0.0  ;;  %v2739_v35 = vadd.f32 %v2994_v21, %v2724_v41 }
 0x3d2   : > { %v2737_v28 = vadd.f32 %v2994_v21, %v2722_v2  ;;  %v2744_v16 = vmax.f32 %v2736_v38, 0.0 }
 0x3d3   : > { %v2747_v23 = vmax.f32 %v2739_v35, 0.0 }
 0x3d4   : > { %2752 = vxpose.xlu0.b32.start [1/8] (short) (narrow) %v2744_v16, 8  ;;  %v2745_v40 = vmax.f32 %v2737_v28, 0.0 }
 0x3d8   : > { %2753 = vxpose.xlu0.b32.cont [2/8] (short) (narrow) %v2745_v40, 8 }
 0x3dc   : > { %2754 = vxpose.xlu0.b32.cont [3/8] (short) (narrow) %v2746_v53, 8 }
 0x3e0   : > { %2755 = vxpose.xlu0.b32.cont [4/8] (short) (narrow) %v2747_v23, 8 }
 0x3f1   : > { %v3052_v42 = vpop.f32.mrb[4].mxu1 }
 0x3f2   : > { %v2699_v19 = vpop.f32.mrb[5].mxu1  ;;  %v2727_v45 = vmul.f32 %v3052_v42, %v2993_v47 }
 0x3f3   : > { %v2725_v29 = vmul.f32 %v2993_v47, %v2699_v19  ;;  %v3053_v56 = vpop.f32.mrb[6].mxu1 }
 0x3f4   : > { %v2702_v39 = vpop.f32.mrb[7].mxu1  ;;  %v2742_v59 = vadd.f32 %v2994_v21, %v2727_v45  ;;  %v2728_v60 = vmul.f32 %v3053_v56, %v2993_v47 }
 0x3f5   : > { %v2740_v50 = vadd.f32 %v2994_v21, %v2725_v29  ;;  %v2726_v37 = vmul.f32 %v2993_v47, %v2702_v39 }
 0x3f6   : > { %v2750_v32 = vmax.f32 %v2742_v59, 0.0  ;;  %v2743_v33 = vadd.f32 %v2994_v21, %v2728_v60 }
 0x3f7   : > { %v2748_v30 = vmax.f32 %v2740_v50, 0.0  ;;  %v2741_v57 = vadd.f32 %v2994_v21, %v2726_v37 }
 0x3f8   : > { %v2751_v34 = vmax.f32 %v2743_v33, 0.0 }
 0x3f9   : > { %2756 = vxpose.xlu0.b32.cont [5/8] (short) (narrow) %v2748_v30, 8  ;;  %v2749_v31 = vmax.f32 %v2741_v57, 0.0 }
 0x3fd   : > { %2757 = vxpose.xlu0.b32.cont [6/8] (short) (narrow) %v2749_v31, 8 }
 0x401   : > { %2758 = vxpose.xlu0.b32.cont [7/8] (short) (narrow) %v2750_v32, 8 }
 0x405   : > { %2759 = vxpose.xlu0.b32.end [8/8] (short) (narrow) %v2751_v34, 8 }
 0x469   : > { %v2768_v7 = vpop.trf.xlu0 }
 0x46a   : > { %2785 = vst.msk [vmem:[%s276_s29] sm:$0xff] %vm2784_vm8, %v2768_v7 }
 0x46b PF: > { %s17_s24 = sadd.s32 1, %s3117_s24  }
 0x46c   : > { %p14_p4 = scmp.ge.s32.totalorder %s17_s24, 4  }
 0x46e   :  { %16 = sbr.rel (!%p14_p4) target bundleno = 1 (0x1), region = 82 }

</bundles_post_ra>
